<compile_context>
chip_gen: v6e
topology: v6e:2x2x1
jax: 0.10.0
libtpu: 0.0.40
codegen_flags: <defaults>
</compile_context>

<pallas_src>
import math

import numpy as np
import jax
import jax.numpy as jnp
from jax.experimental import pallas as pl
from jax.experimental.pallas import tpu as pltpu

# ---------------- hyper-parameters (small, consistent with the module) -------
B = 2        # batch
W = 8        # window_size
F = 4        # num_features
H = 32       # hidden_size
O = 4        # output_size
KSIZE = 2    # pcnn_kernel_size
STRIDE = 1   # pcnn_stride (kernel assumes 1)
PAD = 1      # pcnn_padding
DIL = 1      # pcnn_dilation

assert STRIDE == 1


def _full_spec(shape):
    # whole-array block; index_map ignores the (size-1) grid index
    return pl.BlockSpec(shape, lambda *_, n=len(shape): (0,) * n)


_CPARAMS = pltpu.CompilerParams(dimension_semantics=("arbitrary",))


# --------------------------- single fused kernel ------------------------------
def fused_forward_kernel(
        # data
        xpad_ref, xtime_ref, xlast_ref,
        # dilated-conv weights
        ctaps_ref, cbias_ref,
        # attention diag weights
        wqf_ref, wkf_ref, wqt_ref, wkt_ref,
        # feature-graph GCN
        gf1w_ref, gf1b_ref, gf2w_ref, gf2b_ref, gf3w_ref, gf3b_ref,
        # time-graph GCN
        gt1w_ref, gt1b_ref, gt2w_ref, gt2b_ref, gt3w_ref, gt3b_ref,
        # head
        pwf_ref, pwt_ref, pbias_ref,
        lbw_ref, lbb_ref,
        f1n_ref, f1l_ref, f1b_ref,
        f2w_ref, f2b_ref,
        f3w_ref, f3b_ref,
        # outputs
        out_ref, wfeat_ref, wtime_ref):
    f32 = jnp.float32

    def mm(a, b):                               # a @ b
        return jnp.dot(a, b, preferred_element_type=f32)

    def mm_ta(a, b):                            # a.T @ b   (contract dim0 with dim0)
        return jax.lax.dot_general(a, b, (((0,), (0,)), ((), ())),
                                   preferred_element_type=f32)

    def mm_tb(a, b):                            # a @ b.T   (contract dim1 with dim1)
        return jax.lax.dot_general(a, b, (((1,), (1,)), ((), ())),
                                   preferred_element_type=f32)

    n_batch, w_len, _ = xtime_ref.shape
    k_taps, n_out_ch, _ = ctaps_ref.shape
    l_out = w_len + PAD - DIL * (k_taps - 1)    # causal slice [:, :, :-pad]

    # ---- DilatedCNN: causal dilated Conv1d on the torch.reshape'd (B, F, W) view
    x_feat = []                                 # per-sample (F, W) node tensors
    for b in range(n_batch):
        xb = xpad_ref[b]                        # (F, W + 2*PAD)
        acc = jnp.zeros((n_out_ch, l_out), f32)
        for t in range(k_taps):                 # static, tiny kernel size
            acc = acc + mm(ctaps_ref[t], xb[:, t * DIL:t * DIL + l_out])
        x_feat.append(acc + cbias_ref[...])     # (F, 1) bias broadcast over length

    x_time = [xtime_ref[b] for b in range(n_batch)]   # per-sample (W, F)

    # ---- diag-scaled scaled-dot-product attention, softmax, mean over batch
    def attn_mean(nodes, wq_ref, wk_ref):
        d = nodes[0].shape[1]
        scale = 1.0 / math.sqrt(d)
        acc = None
        for xb in nodes:
            q = wq_ref[...] * xb                # einsum('jj,ijk->ijk', Wq, X) per sample
            k = wk_ref[...] * xb
            s = mm_tb(q, k) * scale             # (N, N) scores
            s = s - jnp.max(s, axis=-1, keepdims=True)
            e = jnp.exp(s)
            sm = e / jnp.sum(e, axis=-1, keepdims=True)     # exact softmax
            acc = sm if acc is None else acc + sm
        return acc * (1.0 / len(nodes))         # torch.mean(attn, dim=0)

    wm_feat = attn_mean(x_feat, wqf_ref, wkf_ref)   # (F, F)
    wm_time = attn_mean(x_time, wqt_ref, wkt_ref)   # (W, W)

    # ---- dense PyG gcn_norm + 3 stacked GCNConv layers + mean pool over nodes
    def gcn_branch(nodes, wm, w_refs, b_refs):
        n = wm.shape[0]
        # deg[j] = sum_i wm[i, j]; need it in both lane (1,N) and sublane (N,1) layouts.
        deg_row = jnp.sum(wm, axis=0, keepdims=True)              # (1, N)
        deg_col = mm_ta(wm, jnp.ones((n, 1), f32))                # (N, 1) — no transpose
        dinv_row = jnp.where(deg_row > 0, jax.lax.rsqrt(deg_row), 0.0)
        dinv_col = jnp.where(deg_col > 0, jax.lax.rsqrt(deg_col), 0.0)
        ahat = dinv_col * wm * dinv_row                           # D^-1/2 W D^-1/2

        pooled = []
        for xb in nodes:
            h = xb
            for w_ref, b_ref in zip(w_refs, b_refs):
                hw = mm(h, w_ref[...])                            # lin: (N,Din)@(Din,H)
                h = mm_ta(ahat, hw) + b_ref[...]                  # aggr: Ahat^T @ hw + bias
            pooled.append(jnp.mean(h, axis=0, keepdims=True))     # (1, H) mean pool
        return jnp.concatenate(pooled, axis=0)                    # (B, H)

    out_feat = gcn_branch(x_feat, wm_feat,
                          (gf1w_ref, gf2w_ref, gf3w_ref),
                          (gf1b_ref, gf2b_ref, gf3b_ref))         # (B, H)
    out_time = gcn_branch(x_time, wm_time,
                          (gt1w_ref, gt2w_ref, gt3w_ref),
                          (gt1b_ref, gt2b_ref, gt3b_ref))         # (B, H)

    # ---- head: concats expressed as split-weight matmuls (weights split at prep time)
    nonlin = mm(out_feat, pwf_ref[...]) + mm(out_time, pwt_ref[...]) + pbias_ref[...]
    lin = mm(xlast_ref[...], lbw_ref[...]) + lbb_ref[...]
    h = mm(nonlin, f1n_ref[...]) + mm(lin, f1l_ref[...]) + f1b_ref[...]
    h = mm(h, f2w_ref[...]) + f2b_ref[...]
    out_ref[...] = mm(h, f3w_ref[...]) + f3b_ref[...]             # (B, 1)
    wfeat_ref[...] = wm_feat
    wtime_ref[...] = wm_time
    # TODO(synk): nn.Dropout on the attention weights is a no-op here (p=0, and it only
    # feeds the discarded attention output), so it is intentionally omitted.


# ------------------- one-time weight preprocessing (hoisted) -------------------
def prepare_params(p):
    """Transposes / diag extraction / concat-weight splits done once, not per forward."""
    h = p['gf1_w'].shape[0]
    o = p['proj_w'].shape[0]
    return (
        jnp.transpose(p['conv_w'], (2, 0, 1)),                    # (K, O, C) conv taps
        p['conv_b'][:, None],                                     # (F, 1)
        jnp.diag(p['Wq_feat'])[:, None], jnp.diag(p['Wk_feat'])[:, None],
        jnp.diag(p['Wq_time'])[:, None], jnp.diag(p['Wk_time'])[:, None],
        p['gf1_w'].T, p['gf1_b'][None, :],
        p['gf2_w'].T, p['gf2_b'][None, :],
        p['gf3_w'].T, p['gf3_b'][None, :],
        p['gt1_w'].T, p['gt1_b'][None, :],
        p['gt2_w'].T, p['gt2_b'][None, :],
        p['gt3_w'].T, p['gt3_b'][None, :],
        p['proj_w'][:, :h].T, p['proj_w'][:, h:].T, p['proj_b'][None, :],
        p['lb_w'].T, p['lb_b'][None, :],
        p['f1_w'][:, :o].T, p['f1_w'][:, o:].T, p['f1_b'][None, :],
        p['f2_w'].T, p['f2_b'][None, :],
        p['f3_w'].T, p['f3_b'][None, :],
    )


# ------------------------------ full forward ----------------------------------
@jax.jit
def tabular_graph_forward(prep, x_time):
    b, w, f = x_time.shape
    x_last = x_time[:, :, -1]                              # (B, W) -> linear branch
    # NOTE: torch.reshape (row-major), NOT a transpose — reproduced exactly.
    x_ncw = jnp.reshape(x_time, (b, f, w))                 # (B, F, W)
    xpad = jnp.pad(x_ncw, ((0, 0), (0, 0), (PAD, PAD)))    # conv-ready padded input

    args = (xpad, x_time, x_last) + tuple(prep)
    out_shapes = (jax.ShapeDtypeStruct((b, 1), jnp.float32),
                  jax.ShapeDtypeStruct((f, f), jnp.float32),
                  jax.ShapeDtypeStruct((w, w), jnp.float32))
    out, wfeat, wtime = pl.pallas_call(
        fused_forward_kernel,
        out_shape=out_shapes,
        grid=(1,),
        in_specs=[_full_spec(a.shape) for a in args],
        out_specs=tuple(_full_spec(s.shape) for s in out_shapes),
        compiler_params=_CPARAMS,
    )(*args)
    return out, (wfeat.reshape(-1), wtime.reshape(-1))


# --------------------------- pure-JAX reference --------------------------------
def forward_reference(p, x_time):
    b, w, f = x_time.shape
    x_last = x_time[:, :, -1]
    x_feat = jnp.reshape(x_time, (b, f, w))
    k = p['conv_w'].shape[-1]
    xpad = jnp.pad(x_feat, ((0, 0), (0, 0), (PAD, PAD)))
    l_out = w + 2 * PAD - DIL * (k - 1) - PAD
    conv = sum(jnp.einsum('oc,bcl->bol', p['conv_w'][:, :, t],
                          xpad[:, :, t * DIL:t * DIL + l_out]) for t in range(k))
    x_feat = conv + p['conv_b'][None, :, None]

    def attn_mean(x, wq, wk):
        q = jnp.diag(wq)[None, :, None] * x
        kk = jnp.diag(wk)[None, :, None] * x
        s = jnp.einsum('bnd,bmd->bnm', q, kk) / math.sqrt(x.shape[-1])
        return jnp.mean(jax.nn.softmax(s, axis=-1), axis=0)

    def gcn_norm_dense(wm):
        deg = jnp.sum(wm, axis=0)
        dinv = jnp.where(deg > 0, jax.lax.rsqrt(deg), 0.0)
        return dinv[:, None] * wm * dinv[None, :]

    def gcn3(x, wm, w1, b1, w2, b2, w3, b3):
        ahat = gcn_norm_dense(wm)

        def layer(h, wgt, bias):
            h = h @ wgt.T
            return jnp.einsum('ij,bih->bjh', ahat, h) + bias

        h = layer(x, w1, b1)
        h = layer(h, w2, b2)
        h = layer(h, w3, b3)
        return jnp.mean(h, axis=1)

    wf_m = attn_mean(x_feat, p['Wq_feat'], p['Wk_feat'])
    wt_m = attn_mean(x_time, p['Wq_time'], p['Wk_time'])
    out_feat = gcn3(x_feat, wf_m, p['gf1_w'], p['gf1_b'], p['gf2_w'], p['gf2_b'],
                    p['gf3_w'], p['gf3_b'])
    out_time = gcn3(x_time, wt_m, p['gt1_w'], p['gt1_b'], p['gt2_w'], p['gt2_b'],
                    p['gt3_w'], p['gt3_b'])
    nonlin = jnp.concatenate([out_feat, out_time], -1) @ p['proj_w'].T + p['proj_b']
    lin = x_last @ p['lb_w'].T + p['lb_b']
    h = jnp.concatenate([nonlin, lin], -1) @ p['f1_w'].T + p['f1_b']
    h = h @ p['f2_w'].T + p['f2_b']
    out = h @ p['f3_w'].T + p['f3_b']
    return out, wf_m.reshape(-1), wt_m.reshape(-1)


# ------------------------------ params / main ----------------------------------
def init_params(key):
    ks = iter(jax.random.split(key, 40))

    def nrm(shape, scale=0.1):
        return scale * jax.random.normal(next(ks), shape, jnp.float32)

    return {
        'conv_w': nrm((F, F, KSIZE)), 'conv_b': nrm((F,)),
        'Wq_time': nrm((W, W), 1.0), 'Wk_time': nrm((W, W), 1.0), 'Wv_time': nrm((W, W), 1.0),
        'Wq_feat': nrm((F, F), 1.0), 'Wk_feat': nrm((F, F), 1.0), 'Wv_feat': nrm((F, F), 1.0),
        'gf1_w': nrm((H, W)), 'gf1_b': nrm((H,)),
        'gf2_w': nrm((H, H)), 'gf2_b': nrm((H,)),
        'gf3_w': nrm((H, H)), 'gf3_b': nrm((H,)),
        'gt1_w': nrm((H, F)), 'gt1_b': nrm((H,)),
        'gt2_w': nrm((H, H)), 'gt2_b': nrm((H,)),
        'gt3_w': nrm((H, H)), 'gt3_b': nrm((H,)),
        'proj_w': nrm((O, 2 * H)), 'proj_b': nrm((O,)),
        'lb_w': nrm((O, W)), 'lb_b': nrm((O,)),
        'f1_w': nrm((16, 2 * O)), 'f1_b': nrm((16,)),
        'f2_w': nrm((8, 16)), 'f2_b': nrm((8,)),
        'f3_w': nrm((1, 8)), 'f3_b': nrm((1,)),
    }


if __name__ == "__main__":
    root = jax.random.PRNGKey(0)
    kp, kx = jax.random.split(root)
    params = init_params(kp)
    x_time = jax.random.normal(kx, (B, W, F), jnp.float32)

    prep = prepare_params(params)                 # one-time, outside the per-step path
    out, (wf, wt) = jax.block_until_ready(tabular_graph_forward(prep, x_time))

    out_ref, wf_ref, wt_ref = forward_reference(params, x_time)
    np.testing.assert_allclose(np.asarray(out), np.asarray(out_ref), rtol=2e-4, atol=2e-4)
    np.testing.assert_allclose(np.asarray(wf), np.asarray(wf_ref), rtol=2e-4, atol=2e-4)
    np.testing.assert_allclose(np.asarray(wt), np.asarray(wt_ref), rtol=2e-4, atol=2e-4)

    print("KERNEL_OK")
</pallas_src>

<mosaic_0001>
module attributes {stable_mosaic.version = 11 : i64} {
  func.func @fused_forward_kernel(%arg0: i32, %arg1: memref<2x4x10xf32, #tpu.memory_space<vmem>>, %arg2: memref<2x8x4xf32, #tpu.memory_space<vmem>>, %arg3: memref<2x8xf32, #tpu.memory_space<vmem>>, %arg4: memref<2x4x4xf32, #tpu.memory_space<vmem>>, %arg5: memref<4x1xf32, #tpu.memory_space<vmem>>, %arg6: memref<4x1xf32, #tpu.memory_space<vmem>>, %arg7: memref<4x1xf32, #tpu.memory_space<vmem>>, %arg8: memref<8x1xf32, #tpu.memory_space<vmem>>, %arg9: memref<8x1xf32, #tpu.memory_space<vmem>>, %arg10: memref<8x32xf32, #tpu.memory_space<vmem>>, %arg11: memref<1x32xf32, #tpu.memory_space<vmem>>, %arg12: memref<32x32xf32, #tpu.memory_space<vmem>>, %arg13: memref<1x32xf32, #tpu.memory_space<vmem>>, %arg14: memref<32x32xf32, #tpu.memory_space<vmem>>, %arg15: memref<1x32xf32, #tpu.memory_space<vmem>>, %arg16: memref<4x32xf32, #tpu.memory_space<vmem>>, %arg17: memref<1x32xf32, #tpu.memory_space<vmem>>, %arg18: memref<32x32xf32, #tpu.memory_space<vmem>>, %arg19: memref<1x32xf32, #tpu.memory_space<vmem>>, %arg20: memref<32x32xf32, #tpu.memory_space<vmem>>, %arg21: memref<1x32xf32, #tpu.memory_space<vmem>>, %arg22: memref<32x4xf32, #tpu.memory_space<vmem>>, %arg23: memref<32x4xf32, #tpu.memory_space<vmem>>, %arg24: memref<1x4xf32, #tpu.memory_space<vmem>>, %arg25: memref<8x4xf32, #tpu.memory_space<vmem>>, %arg26: memref<1x4xf32, #tpu.memory_space<vmem>>, %arg27: memref<4x16xf32, #tpu.memory_space<vmem>>, %arg28: memref<4x16xf32, #tpu.memory_space<vmem>>, %arg29: memref<1x16xf32, #tpu.memory_space<vmem>>, %arg30: memref<16x8xf32, #tpu.memory_space<vmem>>, %arg31: memref<1x8xf32, #tpu.memory_space<vmem>>, %arg32: memref<8x1xf32, #tpu.memory_space<vmem>>, %arg33: memref<1x1xf32, #tpu.memory_space<vmem>>, %arg34: memref<2x1xf32, #tpu.memory_space<vmem>>, %arg35: memref<4x4xf32, #tpu.memory_space<vmem>>, %arg36: memref<8x8xf32, #tpu.memory_space<vmem>>) attributes {dimension_semantics = [#tpu.dimension_semantics<arbitrary>], iteration_bounds = array<i64: 1>, scalar_prefetch = 0 : i64, scratch_operands = 0 : i64, tpu.core_type = #tpu.core_type<tc>, window_params = [{pipeline_mode = #tpu.pipeline_mode<synchronous>, transform_indices = @transform_0, window_bounds = array<i64: 2, 4, 10>}, {pipeline_mode = #tpu.pipeline_mode<synchronous>, transform_indices = @transform_1, window_bounds = array<i64: 2, 8, 4>}, {pipeline_mode = #tpu.pipeline_mode<synchronous>, transform_indices = @transform_2, window_bounds = array<i64: 2, 8>}, {pipeline_mode = #tpu.pipeline_mode<synchronous>, transform_indices = @transform_3, window_bounds = array<i64: 2, 4, 4>}, {pipeline_mode = #tpu.pipeline_mode<synchronous>, transform_indices = @transform_4, window_bounds = array<i64: 4, 1>}, {pipeline_mode = #tpu.pipeline_mode<synchronous>, transform_indices = @transform_5, window_bounds = array<i64: 4, 1>}, {pipeline_mode = #tpu.pipeline_mode<synchronous>, transform_indices = @transform_6, window_bounds = array<i64: 4, 1>}, {pipeline_mode = #tpu.pipeline_mode<synchronous>, transform_indices = @transform_7, window_bounds = array<i64: 8, 1>}, {pipeline_mode = #tpu.pipeline_mode<synchronous>, transform_indices = @transform_8, window_bounds = array<i64: 8, 1>}, {pipeline_mode = #tpu.pipeline_mode<synchronous>, transform_indices = @transform_9, window_bounds = array<i64: 8, 32>}, {pipeline_mode = #tpu.pipeline_mode<synchronous>, transform_indices = @transform_10, window_bounds = array<i64: 1, 32>}, {pipeline_mode = #tpu.pipeline_mode<synchronous>, transform_indices = @transform_11, window_bounds = array<i64: 32, 32>}, {pipeline_mode = #tpu.pipeline_mode<synchronous>, transform_indices = @transform_12, window_bounds = array<i64: 1, 32>}, {pipeline_mode = #tpu.pipeline_mode<synchronous>, transform_indices = @transform_13, window_bounds = array<i64: 32, 32>}, {pipeline_mode = #tpu.pipeline_mode<synchronous>, transform_indices = @transform_14, window_bounds = array<i64: 1, 32>}, {pipeline_mode = #tpu.pipeline_mode<synchronous>, transform_indices = @transform_15, window_bounds = array<i64: 4, 32>}, {pipeline_mode = #tpu.pipeline_mode<synchronous>, transform_indices = @transform_16, window_bounds = array<i64: 1, 32>}, {pipeline_mode = #tpu.pipeline_mode<synchronous>, transform_indices = @transform_17, window_bounds = array<i64: 32, 32>}, {pipeline_mode = #tpu.pipeline_mode<synchronous>, transform_indices = @transform_18, window_bounds = array<i64: 1, 32>}, {pipeline_mode = #tpu.pipeline_mode<synchronous>, transform_indices = @transform_19, window_bounds = array<i64: 32, 32>}, {pipeline_mode = #tpu.pipeline_mode<synchronous>, transform_indices = @transform_20, window_bounds = array<i64: 1, 32>}, {pipeline_mode = #tpu.pipeline_mode<synchronous>, transform_indices = @transform_21, window_bounds = array<i64: 32, 4>}, {pipeline_mode = #tpu.pipeline_mode<synchronous>, transform_indices = @transform_22, window_bounds = array<i64: 32, 4>}, {pipeline_mode = #tpu.pipeline_mode<synchronous>, transform_indices = @transform_23, window_bounds = array<i64: 1, 4>}, {pipeline_mode = #tpu.pipeline_mode<synchronous>, transform_indices = @transform_24, window_bounds = array<i64: 8, 4>}, {pipeline_mode = #tpu.pipeline_mode<synchronous>, transform_indices = @transform_25, window_bounds = array<i64: 1, 4>}, {pipeline_mode = #tpu.pipeline_mode<synchronous>, transform_indices = @transform_26, window_bounds = array<i64: 4, 16>}, {pipeline_mode = #tpu.pipeline_mode<synchronous>, transform_indices = @transform_27, window_bounds = array<i64: 4, 16>}, {pipeline_mode = #tpu.pipeline_mode<synchronous>, transform_indices = @transform_28, window_bounds = array<i64: 1, 16>}, {pipeline_mode = #tpu.pipeline_mode<synchronous>, transform_indices = @transform_29, window_bounds = array<i64: 16, 8>}, {pipeline_mode = #tpu.pipeline_mode<synchronous>, transform_indices = @transform_30, window_bounds = array<i64: 1, 8>}, {pipeline_mode = #tpu.pipeline_mode<synchronous>, transform_indices = @transform_31, window_bounds = array<i64: 8, 1>}, {pipeline_mode = #tpu.pipeline_mode<synchronous>, transform_indices = @transform_32, window_bounds = array<i64: 1, 1>}, {pipeline_mode = #tpu.pipeline_mode<synchronous>, transform_indices = @transform_33, window_bounds = array<i64: 2, 1>}, {pipeline_mode = #tpu.pipeline_mode<synchronous>, transform_indices = @transform_34, window_bounds = array<i64: 4, 4>}, {pipeline_mode = #tpu.pipeline_mode<synchronous>, transform_indices = @transform_35, window_bounds = array<i64: 8, 8>}]} {
    %c0 = arith.constant 0 : index
    %c0_0 = arith.constant 0 : index
    %c0_1 = arith.constant 0 : index
    %0 = vector.load %arg1[%c0, %c0_0, %c0_1] : memref<2x4x10xf32, #tpu.memory_space<vmem>>, vector<1x4x10xf32>
    %1 = vector.shape_cast %0 : vector<1x4x10xf32> to vector<4x10xf32>
    %cst = arith.constant 0.000000e+00 : f32
    %2 = vector.broadcast %cst : f32 to vector<4x8xf32>
    %c0_2 = arith.constant 0 : index
    %c0_3 = arith.constant 0 : index
    %c0_4 = arith.constant 0 : index
    %3 = vector.load %arg4[%c0_2, %c0_3, %c0_4] : memref<2x4x4xf32, #tpu.memory_space<vmem>>, vector<1x4x4xf32>
    %4 = vector.shape_cast %3 : vector<1x4x4xf32> to vector<4x4xf32>
    %5 = vector.extract_strided_slice %1 {offsets = [0, 0], sizes = [4, 8], strides = [1, 1]} : vector<4x10xf32> to vector<4x8xf32>
    %cst_5 = arith.constant dense<0.000000e+00> : vector<4x8xf32>
    %6 = tpu.matmul %4, %5, %cst_5 {dimension_numbers = #tpu.dot_dimension_numbers<[1], [0], [0], [1], [0, 0, 1, 1], [], []>} : vector<4x4xf32>, vector<4x8xf32>, vector<4x8xf32> -> vector<4x8xf32>
    %7 = arith.addf %2, %6 : vector<4x8xf32>
    %c1 = arith.constant 1 : index
    %c0_6 = arith.constant 0 : index
    %c0_7 = arith.constant 0 : index
    %8 = vector.load %arg4[%c1, %c0_6, %c0_7] : memref<2x4x4xf32, #tpu.memory_space<vmem>>, vector<1x4x4xf32>
    %9 = vector.shape_cast %8 : vector<1x4x4xf32> to vector<4x4xf32>
    %10 = vector.extract_strided_slice %1 {offsets = [0, 1], sizes = [4, 8], strides = [1, 1]} : vector<4x10xf32> to vector<4x8xf32>
    %cst_8 = arith.constant dense<0.000000e+00> : vector<4x8xf32>
    %11 = tpu.matmul %9, %10, %cst_8 {dimension_numbers = #tpu.dot_dimension_numbers<[1], [0], [0], [1], [0, 0, 1, 1], [], []>} : vector<4x4xf32>, vector<4x8xf32>, vector<4x8xf32> -> vector<4x8xf32>
    %12 = arith.addf %7, %11 : vector<4x8xf32>
    %c0_9 = arith.constant 0 : index
    %c0_10 = arith.constant 0 : index
    %13 = vector.load %arg5[%c0_9, %c0_10] : memref<4x1xf32, #tpu.memory_space<vmem>>, vector<4x1xf32>
    %14 = vector.broadcast %13 : vector<4x1xf32> to vector<4x8xf32>
    %15 = arith.addf %12, %14 : vector<4x8xf32>
    %c1_11 = arith.constant 1 : index
    %c0_12 = arith.constant 0 : index
    %c0_13 = arith.constant 0 : index
    %16 = vector.load %arg1[%c1_11, %c0_12, %c0_13] : memref<2x4x10xf32, #tpu.memory_space<vmem>>, vector<1x4x10xf32>
    %17 = vector.shape_cast %16 : vector<1x4x10xf32> to vector<4x10xf32>
    %cst_14 = arith.constant 0.000000e+00 : f32
    %18 = vector.broadcast %cst_14 : f32 to vector<4x8xf32>
    %c0_15 = arith.constant 0 : index
    %c0_16 = arith.constant 0 : index
    %c0_17 = arith.constant 0 : index
    %19 = vector.load %arg4[%c0_15, %c0_16, %c0_17] : memref<2x4x4xf32, #tpu.memory_space<vmem>>, vector<1x4x4xf32>
    %20 = vector.shape_cast %19 : vector<1x4x4xf32> to vector<4x4xf32>
    %21 = vector.extract_strided_slice %17 {offsets = [0, 0], sizes = [4, 8], strides = [1, 1]} : vector<4x10xf32> to vector<4x8xf32>
    %cst_18 = arith.constant dense<0.000000e+00> : vector<4x8xf32>
    %22 = tpu.matmul %20, %21, %cst_18 {dimension_numbers = #tpu.dot_dimension_numbers<[1], [0], [0], [1], [0, 0, 1, 1], [], []>} : vector<4x4xf32>, vector<4x8xf32>, vector<4x8xf32> -> vector<4x8xf32>
    %23 = arith.addf %18, %22 : vector<4x8xf32>
    %c1_19 = arith.constant 1 : index
    %c0_20 = arith.constant 0 : index
    %c0_21 = arith.constant 0 : index
    %24 = vector.load %arg4[%c1_19, %c0_20, %c0_21] : memref<2x4x4xf32, #tpu.memory_space<vmem>>, vector<1x4x4xf32>
    %25 = vector.shape_cast %24 : vector<1x4x4xf32> to vector<4x4xf32>
    %26 = vector.extract_strided_slice %17 {offsets = [0, 1], sizes = [4, 8], strides = [1, 1]} : vector<4x10xf32> to vector<4x8xf32>
    %cst_22 = arith.constant dense<0.000000e+00> : vector<4x8xf32>
    %27 = tpu.matmul %25, %26, %cst_22 {dimension_numbers = #tpu.dot_dimension_numbers<[1], [0], [0], [1], [0, 0, 1, 1], [], []>} : vector<4x4xf32>, vector<4x8xf32>, vector<4x8xf32> -> vector<4x8xf32>
    %28 = arith.addf %23, %27 : vector<4x8xf32>
    %c0_23 = arith.constant 0 : index
    %c0_24 = arith.constant 0 : index
    %29 = vector.load %arg5[%c0_23, %c0_24] : memref<4x1xf32, #tpu.memory_space<vmem>>, vector<4x1xf32>
    %30 = vector.broadcast %29 : vector<4x1xf32> to vector<4x8xf32>
    %31 = arith.addf %28, %30 : vector<4x8xf32>
    %c0_25 = arith.constant 0 : index
    %c0_26 = arith.constant 0 : index
    %c0_27 = arith.constant 0 : index
    %32 = vector.load %arg2[%c0_25, %c0_26, %c0_27] : memref<2x8x4xf32, #tpu.memory_space<vmem>>, vector<1x8x4xf32>
    %33 = vector.shape_cast %32 : vector<1x8x4xf32> to vector<8x4xf32>
    %c1_28 = arith.constant 1 : index
    %c0_29 = arith.constant 0 : index
    %c0_30 = arith.constant 0 : index
    %34 = vector.load %arg2[%c1_28, %c0_29, %c0_30] : memref<2x8x4xf32, #tpu.memory_space<vmem>>, vector<1x8x4xf32>
    %35 = vector.shape_cast %34 : vector<1x8x4xf32> to vector<8x4xf32>
    %c0_31 = arith.constant 0 : index
    %c0_32 = arith.constant 0 : index
    %36 = vector.load %arg6[%c0_31, %c0_32] : memref<4x1xf32, #tpu.memory_space<vmem>>, vector<4x1xf32>
    %37 = vector.broadcast %36 : vector<4x1xf32> to vector<4x8xf32>
    %38 = arith.mulf %37, %15 : vector<4x8xf32>
    %c0_33 = arith.constant 0 : index
    %c0_34 = arith.constant 0 : index
    %39 = vector.load %arg7[%c0_33, %c0_34] : memref<4x1xf32, #tpu.memory_space<vmem>>, vector<4x1xf32>
    %40 = vector.broadcast %39 : vector<4x1xf32> to vector<4x8xf32>
    %41 = arith.mulf %40, %15 : vector<4x8xf32>
    %cst_35 = arith.constant dense<0.000000e+00> : vector<4x4xf32>
    %42 = tpu.matmul %38, %41, %cst_35 {dimension_numbers = #tpu.dot_dimension_numbers<[1], [1], [0], [0], [0, 0, 1, 0], [], []>} : vector<4x8xf32>, vector<4x8xf32>, vector<4x4xf32> -> vector<4x4xf32>
    %cst_36 = arith.constant 0.353553385 : f32
    %43 = vector.broadcast %cst_36 : f32 to vector<4x4xf32>
    %44 = arith.mulf %42, %43 : vector<4x4xf32>
    %cst_37 = arith.constant dense<0xFF800000> : vector<4xf32>
    %45 = vector.multi_reduction <maximumf>, %44, %cst_37 [1] : vector<4x4xf32> to vector<4xf32>
    %46 = vector.shape_cast %45 : vector<4xf32> to vector<4x1xf32>
    %47 = vector.broadcast %46 : vector<4x1xf32> to vector<4x4xf32>
    %48 = arith.subf %44, %47 : vector<4x4xf32>
    %49 = math.exp %48 : vector<4x4xf32>
    %cst_38 = arith.constant dense<0.000000e+00> : vector<4xf32>
    %50 = vector.multi_reduction <add>, %49, %cst_38 [1] : vector<4x4xf32> to vector<4xf32>
    %51 = vector.shape_cast %50 : vector<4xf32> to vector<4x1xf32>
    %52 = vector.broadcast %51 : vector<4x1xf32> to vector<4x4xf32>
    %53 = arith.divf %49, %52 : vector<4x4xf32>
    %c0_39 = arith.constant 0 : index
    %c0_40 = arith.constant 0 : index
    %54 = vector.load %arg6[%c0_39, %c0_40] : memref<4x1xf32, #tpu.memory_space<vmem>>, vector<4x1xf32>
    %55 = vector.broadcast %54 : vector<4x1xf32> to vector<4x8xf32>
    %56 = arith.mulf %55, %31 : vector<4x8xf32>
    %c0_41 = arith.constant 0 : index
    %c0_42 = arith.constant 0 : index
    %57 = vector.load %arg7[%c0_41, %c0_42] : memref<4x1xf32, #tpu.memory_space<vmem>>, vector<4x1xf32>
    %58 = vector.broadcast %57 : vector<4x1xf32> to vector<4x8xf32>
    %59 = arith.mulf %58, %31 : vector<4x8xf32>
    %cst_43 = arith.constant dense<0.000000e+00> : vector<4x4xf32>
    %60 = tpu.matmul %56, %59, %cst_43 {dimension_numbers = #tpu.dot_dimension_numbers<[1], [1], [0], [0], [0, 0, 1, 0], [], []>} : vector<4x8xf32>, vector<4x8xf32>, vector<4x4xf32> -> vector<4x4xf32>
    %cst_44 = arith.constant 0.353553385 : f32
    %61 = vector.broadcast %cst_44 : f32 to vector<4x4xf32>
    %62 = arith.mulf %60, %61 : vector<4x4xf32>
    %cst_45 = arith.constant dense<0xFF800000> : vector<4xf32>
    %63 = vector.multi_reduction <maximumf>, %62, %cst_45 [1] : vector<4x4xf32> to vector<4xf32>
    %64 = vector.shape_cast %63 : vector<4xf32> to vector<4x1xf32>
    %65 = vector.broadcast %64 : vector<4x1xf32> to vector<4x4xf32>
    %66 = arith.subf %62, %65 : vector<4x4xf32>
    %67 = math.exp %66 : vector<4x4xf32>
    %cst_46 = arith.constant dense<0.000000e+00> : vector<4xf32>
    %68 = vector.multi_reduction <add>, %67, %cst_46 [1] : vector<4x4xf32> to vector<4xf32>
    %69 = vector.shape_cast %68 : vector<4xf32> to vector<4x1xf32>
    %70 = vector.broadcast %69 : vector<4x1xf32> to vector<4x4xf32>
    %71 = arith.divf %67, %70 : vector<4x4xf32>
    %72 = arith.addf %53, %71 : vector<4x4xf32>
    %cst_47 = arith.constant 5.000000e-01 : f32
    %73 = vector.broadcast %cst_47 : f32 to vector<4x4xf32>
    %74 = arith.mulf %72, %73 : vector<4x4xf32>
    %c0_48 = arith.constant 0 : index
    %c0_49 = arith.constant 0 : index
    %75 = vector.load %arg8[%c0_48, %c0_49] : memref<8x1xf32, #tpu.memory_space<vmem>>, vector<8x1xf32>
    %76 = vector.broadcast %75 : vector<8x1xf32> to vector<8x4xf32>
    %77 = arith.mulf %76, %33 : vector<8x4xf32>
    %c0_50 = arith.constant 0 : index
    %c0_51 = arith.constant 0 : index
    %78 = vector.load %arg9[%c0_50, %c0_51] : memref<8x1xf32, #tpu.memory_space<vmem>>, vector<8x1xf32>
    %79 = vector.broadcast %78 : vector<8x1xf32> to vector<8x4xf32>
    %80 = arith.mulf %79, %33 : vector<8x4xf32>
    %cst_52 = arith.constant dense<0.000000e+00> : vector<8x8xf32>
    %81 = tpu.matmul %77, %80, %cst_52 {dimension_numbers = #tpu.dot_dimension_numbers<[1], [1], [0], [0], [0, 0, 1, 0], [], []>} : vector<8x4xf32>, vector<8x4xf32>, vector<8x8xf32> -> vector<8x8xf32>
    %cst_53 = arith.constant 5.000000e-01 : f32
    %82 = vector.broadcast %cst_53 : f32 to vector<8x8xf32>
    %83 = arith.mulf %81, %82 : vector<8x8xf32>
    %cst_54 = arith.constant dense<0xFF800000> : vector<8xf32>
    %84 = vector.multi_reduction <maximumf>, %83, %cst_54 [1] : vector<8x8xf32> to vector<8xf32>
    %85 = vector.shape_cast %84 : vector<8xf32> to vector<8x1xf32>
    %86 = vector.broadcast %85 : vector<8x1xf32> to vector<8x8xf32>
    %87 = arith.subf %83, %86 : vector<8x8xf32>
    %88 = math.exp %87 : vector<8x8xf32>
    %cst_55 = arith.constant dense<0.000000e+00> : vector<8xf32>
    %89 = vector.multi_reduction <add>, %88, %cst_55 [1] : vector<8x8xf32> to vector<8xf32>
    %90 = vector.shape_cast %89 : vector<8xf32> to vector<8x1xf32>
    %91 = vector.broadcast %90 : vector<8x1xf32> to vector<8x8xf32>
    %92 = arith.divf %88, %91 : vector<8x8xf32>
    %c0_56 = arith.constant 0 : index
    %c0_57 = arith.constant 0 : index
    %93 = vector.load %arg8[%c0_56, %c0_57] : memref<8x1xf32, #tpu.memory_space<vmem>>, vector<8x1xf32>
    %94 = vector.broadcast %93 : vector<8x1xf32> to vector<8x4xf32>
    %95 = arith.mulf %94, %35 : vector<8x4xf32>
    %c0_58 = arith.constant 0 : index
    %c0_59 = arith.constant 0 : index
    %96 = vector.load %arg9[%c0_58, %c0_59] : memref<8x1xf32, #tpu.memory_space<vmem>>, vector<8x1xf32>
    %97 = vector.broadcast %96 : vector<8x1xf32> to vector<8x4xf32>
    %98 = arith.mulf %97, %35 : vector<8x4xf32>
    %cst_60 = arith.constant dense<0.000000e+00> : vector<8x8xf32>
    %99 = tpu.matmul %95, %98, %cst_60 {dimension_numbers = #tpu.dot_dimension_numbers<[1], [1], [0], [0], [0, 0, 1, 0], [], []>} : vector<8x4xf32>, vector<8x4xf32>, vector<8x8xf32> -> vector<8x8xf32>
    %cst_61 = arith.constant 5.000000e-01 : f32
    %100 = vector.broadcast %cst_61 : f32 to vector<8x8xf32>
    %101 = arith.mulf %99, %100 : vector<8x8xf32>
    %cst_62 = arith.constant dense<0xFF800000> : vector<8xf32>
    %102 = vector.multi_reduction <maximumf>, %101, %cst_62 [1] : vector<8x8xf32> to vector<8xf32>
    %103 = vector.shape_cast %102 : vector<8xf32> to vector<8x1xf32>
    %104 = vector.broadcast %103 : vector<8x1xf32> to vector<8x8xf32>
    %105 = arith.subf %101, %104 : vector<8x8xf32>
    %106 = math.exp %105 : vector<8x8xf32>
    %cst_63 = arith.constant dense<0.000000e+00> : vector<8xf32>
    %107 = vector.multi_reduction <add>, %106, %cst_63 [1] : vector<8x8xf32> to vector<8xf32>
    %108 = vector.shape_cast %107 : vector<8xf32> to vector<8x1xf32>
    %109 = vector.broadcast %108 : vector<8x1xf32> to vector<8x8xf32>
    %110 = arith.divf %106, %109 : vector<8x8xf32>
    %111 = arith.addf %92, %110 : vector<8x8xf32>
    %cst_64 = arith.constant 5.000000e-01 : f32
    %112 = vector.broadcast %cst_64 : f32 to vector<8x8xf32>
    %113 = arith.mulf %111, %112 : vector<8x8xf32>
    %cst_65 = arith.constant dense<0.000000e+00> : vector<4xf32>
    %114 = vector.multi_reduction <add>, %74, %cst_65 [0] : vector<4x4xf32> to vector<4xf32>
    %115 = vector.shape_cast %114 : vector<4xf32> to vector<1x4xf32>
    %cst_66 = arith.constant 1.000000e+00 : f32
    %116 = vector.broadcast %cst_66 : f32 to vector<4x1xf32>
    %cst_67 = arith.constant dense<0.000000e+00> : vector<4x1xf32>
    %117 = tpu.matmul %74, %116, %cst_67 {dimension_numbers = #tpu.dot_dimension_numbers<[0], [0], [1], [1], [0, 1, 1, 1], [], []>} : vector<4x4xf32>, vector<4x1xf32>, vector<4x1xf32> -> vector<4x1xf32>
    %cst_68 = arith.constant 0.000000e+00 : f32
    %118 = vector.broadcast %cst_68 : f32 to vector<1x4xf32>
    %119 = arith.cmpf ogt, %115, %118 : vector<1x4xf32>
    %120 = math.rsqrt %115 : vector<1x4xf32>
    %cst_69 = arith.constant 0.000000e+00 : f32
    %121 = vector.broadcast %cst_69 : f32 to vector<1x4xf32>
    %122 = arith.select %119, %120, %121 : vector<1x4xi1>, vector<1x4xf32>
    %cst_70 = arith.constant 0.000000e+00 : f32
    %123 = vector.broadcast %cst_70 : f32 to vector<4x1xf32>
    %124 = arith.cmpf ogt, %117, %123 : vector<4x1xf32>
    %125 = math.rsqrt %117 : vector<4x1xf32>
    %cst_71 = arith.constant 0.000000e+00 : f32
    %126 = vector.broadcast %cst_71 : f32 to vector<4x1xf32>
    %127 = arith.select %124, %125, %126 : vector<4x1xi1>, vector<4x1xf32>
    %128 = vector.broadcast %127 : vector<4x1xf32> to vector<4x4xf32>
    %129 = arith.mulf %128, %74 : vector<4x4xf32>
    %130 = vector.broadcast %122 : vector<1x4xf32> to vector<4x4xf32>
    %131 = arith.mulf %129, %130 : vector<4x4xf32>
    %c0_72 = arith.constant 0 : index
    %c0_73 = arith.constant 0 : index
    %132 = vector.load %arg10[%c0_72, %c0_73] : memref<8x32xf32, #tpu.memory_space<vmem>>, vector<8x32xf32>
    %cst_74 = arith.constant dense<0.000000e+00> : vector<4x32xf32>
    %133 = tpu.matmul %15, %132, %cst_74 {dimension_numbers = #tpu.dot_dimension_numbers<[1], [0], [0], [1], [0, 0, 1, 1], [], []>} : vector<4x8xf32>, vector<8x32xf32>, vector<4x32xf32> -> vector<4x32xf32>
    %cst_75 = arith.constant dense<0.000000e+00> : vector<4x32xf32>
    %134 = tpu.matmul %131, %133, %cst_75 {dimension_numbers = #tpu.dot_dimension_numbers<[0], [0], [1], [1], [0, 1, 1, 1], [], []>} : vector<4x4xf32>, vector<4x32xf32>, vector<4x32xf32> -> vector<4x32xf32>
    %c0_76 = arith.constant 0 : index
    %c0_77 = arith.constant 0 : index
    %135 = vector.load %arg11[%c0_76, %c0_77] : memref<1x32xf32, #tpu.memory_space<vmem>>, vector<1x32xf32>
    %136 = vector.broadcast %135 : vector<1x32xf32> to vector<4x32xf32>
    %137 = arith.addf %134, %136 : vector<4x32xf32>
    %c0_78 = arith.constant 0 : index
    %c0_79 = arith.constant 0 : index
    %138 = vector.load %arg12[%c0_78, %c0_79] : memref<32x32xf32, #tpu.memory_space<vmem>>, vector<32x32xf32>
    %cst_80 = arith.constant dense<0.000000e+00> : vector<4x32xf32>
    %139 = tpu.matmul %137, %138, %cst_80 {dimension_numbers = #tpu.dot_dimension_numbers<[1], [0], [0], [1], [0, 0, 1, 1], [], []>} : vector<4x32xf32>, vector<32x32xf32>, vector<4x32xf32> -> vector<4x32xf32>
    %cst_81 = arith.constant dense<0.000000e+00> : vector<4x32xf32>
    %140 = tpu.matmul %131, %139, %cst_81 {dimension_numbers = #tpu.dot_dimension_numbers<[0], [0], [1], [1], [0, 1, 1, 1], [], []>} : vector<4x4xf32>, vector<4x32xf32>, vector<4x32xf32> -> vector<4x32xf32>
    %c0_82 = arith.constant 0 : index
    %c0_83 = arith.constant 0 : index
    %141 = vector.load %arg13[%c0_82, %c0_83] : memref<1x32xf32, #tpu.memory_space<vmem>>, vector<1x32xf32>
    %142 = vector.broadcast %141 : vector<1x32xf32> to vector<4x32xf32>
    %143 = arith.addf %140, %142 : vector<4x32xf32>
    %c0_84 = arith.constant 0 : index
    %c0_85 = arith.constant 0 : index
    %144 = vector.load %arg14[%c0_84, %c0_85] : memref<32x32xf32, #tpu.memory_space<vmem>>, vector<32x32xf32>
    %cst_86 = arith.constant dense<0.000000e+00> : vector<4x32xf32>
    %145 = tpu.matmul %143, %144, %cst_86 {dimension_numbers = #tpu.dot_dimension_numbers<[1], [0], [0], [1], [0, 0, 1, 1], [], []>} : vector<4x32xf32>, vector<32x32xf32>, vector<4x32xf32> -> vector<4x32xf32>
    %cst_87 = arith.constant dense<0.000000e+00> : vector<4x32xf32>
    %146 = tpu.matmul %131, %145, %cst_87 {dimension_numbers = #tpu.dot_dimension_numbers<[0], [0], [1], [1], [0, 1, 1, 1], [], []>} : vector<4x4xf32>, vector<4x32xf32>, vector<4x32xf32> -> vector<4x32xf32>
    %c0_88 = arith.constant 0 : index
    %c0_89 = arith.constant 0 : index
    %147 = vector.load %arg15[%c0_88, %c0_89] : memref<1x32xf32, #tpu.memory_space<vmem>>, vector<1x32xf32>
    %148 = vector.broadcast %147 : vector<1x32xf32> to vector<4x32xf32>
    %149 = arith.addf %146, %148 : vector<4x32xf32>
    %cst_90 = arith.constant dense<0.000000e+00> : vector<32xf32>
    %150 = vector.multi_reduction <add>, %149, %cst_90 [0] : vector<4x32xf32> to vector<32xf32>
    %151 = vector.shape_cast %150 : vector<32xf32> to vector<1x32xf32>
    %cst_91 = arith.constant 4.000000e+00 : f32
    %152 = vector.broadcast %cst_91 : f32 to vector<1x32xf32>
    %153 = arith.divf %151, %152 : vector<1x32xf32>
    %c0_92 = arith.constant 0 : index
    %c0_93 = arith.constant 0 : index
    %154 = vector.load %arg10[%c0_92, %c0_93] : memref<8x32xf32, #tpu.memory_space<vmem>>, vector<8x32xf32>
    %cst_94 = arith.constant dense<0.000000e+00> : vector<4x32xf32>
    %155 = tpu.matmul %31, %154, %cst_94 {dimension_numbers = #tpu.dot_dimension_numbers<[1], [0], [0], [1], [0, 0, 1, 1], [], []>} : vector<4x8xf32>, vector<8x32xf32>, vector<4x32xf32> -> vector<4x32xf32>
    %cst_95 = arith.constant dense<0.000000e+00> : vector<4x32xf32>
    %156 = tpu.matmul %131, %155, %cst_95 {dimension_numbers = #tpu.dot_dimension_numbers<[0], [0], [1], [1], [0, 1, 1, 1], [], []>} : vector<4x4xf32>, vector<4x32xf32>, vector<4x32xf32> -> vector<4x32xf32>
    %c0_96 = arith.constant 0 : index
    %c0_97 = arith.constant 0 : index
    %157 = vector.load %arg11[%c0_96, %c0_97] : memref<1x32xf32, #tpu.memory_space<vmem>>, vector<1x32xf32>
    %158 = vector.broadcast %157 : vector<1x32xf32> to vector<4x32xf32>
    %159 = arith.addf %156, %158 : vector<4x32xf32>
    %c0_98 = arith.constant 0 : index
    %c0_99 = arith.constant 0 : index
    %160 = vector.load %arg12[%c0_98, %c0_99] : memref<32x32xf32, #tpu.memory_space<vmem>>, vector<32x32xf32>
    %cst_100 = arith.constant dense<0.000000e+00> : vector<4x32xf32>
    %161 = tpu.matmul %159, %160, %cst_100 {dimension_numbers = #tpu.dot_dimension_numbers<[1], [0], [0], [1], [0, 0, 1, 1], [], []>} : vector<4x32xf32>, vector<32x32xf32>, vector<4x32xf32> -> vector<4x32xf32>
    %cst_101 = arith.constant dense<0.000000e+00> : vector<4x32xf32>
    %162 = tpu.matmul %131, %161, %cst_101 {dimension_numbers = #tpu.dot_dimension_numbers<[0], [0], [1], [1], [0, 1, 1, 1], [], []>} : vector<4x4xf32>, vector<4x32xf32>, vector<4x32xf32> -> vector<4x32xf32>
    %c0_102 = arith.constant 0 : index
    %c0_103 = arith.constant 0 : index
    %163 = vector.load %arg13[%c0_102, %c0_103] : memref<1x32xf32, #tpu.memory_space<vmem>>, vector<1x32xf32>
    %164 = vector.broadcast %163 : vector<1x32xf32> to vector<4x32xf32>
    %165 = arith.addf %162, %164 : vector<4x32xf32>
    %c0_104 = arith.constant 0 : index
    %c0_105 = arith.constant 0 : index
    %166 = vector.load %arg14[%c0_104, %c0_105] : memref<32x32xf32, #tpu.memory_space<vmem>>, vector<32x32xf32>
    %cst_106 = arith.constant dense<0.000000e+00> : vector<4x32xf32>
    %167 = tpu.matmul %165, %166, %cst_106 {dimension_numbers = #tpu.dot_dimension_numbers<[1], [0], [0], [1], [0, 0, 1, 1], [], []>} : vector<4x32xf32>, vector<32x32xf32>, vector<4x32xf32> -> vector<4x32xf32>
    %cst_107 = arith.constant dense<0.000000e+00> : vector<4x32xf32>
    %168 = tpu.matmul %131, %167, %cst_107 {dimension_numbers = #tpu.dot_dimension_numbers<[0], [0], [1], [1], [0, 1, 1, 1], [], []>} : vector<4x4xf32>, vector<4x32xf32>, vector<4x32xf32> -> vector<4x32xf32>
    %c0_108 = arith.constant 0 : index
    %c0_109 = arith.constant 0 : index
    %169 = vector.load %arg15[%c0_108, %c0_109] : memref<1x32xf32, #tpu.memory_space<vmem>>, vector<1x32xf32>
    %170 = vector.broadcast %169 : vector<1x32xf32> to vector<4x32xf32>
    %171 = arith.addf %168, %170 : vector<4x32xf32>
    %cst_110 = arith.constant dense<0.000000e+00> : vector<32xf32>
    %172 = vector.multi_reduction <add>, %171, %cst_110 [0] : vector<4x32xf32> to vector<32xf32>
    %173 = vector.shape_cast %172 : vector<32xf32> to vector<1x32xf32>
    %cst_111 = arith.constant 4.000000e+00 : f32
    %174 = vector.broadcast %cst_111 : f32 to vector<1x32xf32>
    %175 = arith.divf %173, %174 : vector<1x32xf32>
    %176 = tpu.concatenate %153, %175 in 0 : vector<1x32xf32>, vector<1x32xf32> -> vector<2x32xf32>
    %cst_112 = arith.constant dense<0.000000e+00> : vector<8xf32>
    %177 = vector.multi_reduction <add>, %113, %cst_112 [0] : vector<8x8xf32> to vector<8xf32>
    %178 = vector.shape_cast %177 : vector<8xf32> to vector<1x8xf32>
    %cst_113 = arith.constant 1.000000e+00 : f32
    %179 = vector.broadcast %cst_113 : f32 to vector<8x1xf32>
    %cst_114 = arith.constant dense<0.000000e+00> : vector<8x1xf32>
    %180 = tpu.matmul %113, %179, %cst_114 {dimension_numbers = #tpu.dot_dimension_numbers<[0], [0], [1], [1], [0, 1, 1, 1], [], []>} : vector<8x8xf32>, vector<8x1xf32>, vector<8x1xf32> -> vector<8x1xf32>
    %cst_115 = arith.constant 0.000000e+00 : f32
    %181 = vector.broadcast %cst_115 : f32 to vector<1x8xf32>
    %182 = arith.cmpf ogt, %178, %181 : vector<1x8xf32>
    %183 = math.rsqrt %178 : vector<1x8xf32>
    %cst_116 = arith.constant 0.000000e+00 : f32
    %184 = vector.broadcast %cst_116 : f32 to vector<1x8xf32>
    %185 = arith.select %182, %183, %184 : vector<1x8xi1>, vector<1x8xf32>
    %cst_117 = arith.constant 0.000000e+00 : f32
    %186 = vector.broadcast %cst_117 : f32 to vector<8x1xf32>
    %187 = arith.cmpf ogt, %180, %186 : vector<8x1xf32>
    %188 = math.rsqrt %180 : vector<8x1xf32>
    %cst_118 = arith.constant 0.000000e+00 : f32
    %189 = vector.broadcast %cst_118 : f32 to vector<8x1xf32>
    %190 = arith.select %187, %188, %189 : vector<8x1xi1>, vector<8x1xf32>
    %191 = vector.broadcast %190 : vector<8x1xf32> to vector<8x8xf32>
    %192 = arith.mulf %191, %113 : vector<8x8xf32>
    %193 = vector.broadcast %185 : vector<1x8xf32> to vector<8x8xf32>
    %194 = arith.mulf %192, %193 : vector<8x8xf32>
    %c0_119 = arith.constant 0 : index
    %c0_120 = arith.constant 0 : index
    %195 = vector.load %arg16[%c0_119, %c0_120] : memref<4x32xf32, #tpu.memory_space<vmem>>, vector<4x32xf32>
    %cst_121 = arith.constant dense<0.000000e+00> : vector<8x32xf32>
    %196 = tpu.matmul %33, %195, %cst_121 {dimension_numbers = #tpu.dot_dimension_numbers<[1], [0], [0], [1], [0, 0, 1, 1], [], []>} : vector<8x4xf32>, vector<4x32xf32>, vector<8x32xf32> -> vector<8x32xf32>
    %cst_122 = arith.constant dense<0.000000e+00> : vector<8x32xf32>
    %197 = tpu.matmul %194, %196, %cst_122 {dimension_numbers = #tpu.dot_dimension_numbers<[0], [0], [1], [1], [0, 1, 1, 1], [], []>} : vector<8x8xf32>, vector<8x32xf32>, vector<8x32xf32> -> vector<8x32xf32>
    %c0_123 = arith.constant 0 : index
    %c0_124 = arith.constant 0 : index
    %198 = vector.load %arg17[%c0_123, %c0_124] : memref<1x32xf32, #tpu.memory_space<vmem>>, vector<1x32xf32>
    %199 = vector.broadcast %198 : vector<1x32xf32> to vector<8x32xf32>
    %200 = arith.addf %197, %199 : vector<8x32xf32>
    %c0_125 = arith.constant 0 : index
    %c0_126 = arith.constant 0 : index
    %201 = vector.load %arg18[%c0_125, %c0_126] : memref<32x32xf32, #tpu.memory_space<vmem>>, vector<32x32xf32>
    %cst_127 = arith.constant dense<0.000000e+00> : vector<8x32xf32>
    %202 = tpu.matmul %200, %201, %cst_127 {dimension_numbers = #tpu.dot_dimension_numbers<[1], [0], [0], [1], [0, 0, 1, 1], [], []>} : vector<8x32xf32>, vector<32x32xf32>, vector<8x32xf32> -> vector<8x32xf32>
    %cst_128 = arith.constant dense<0.000000e+00> : vector<8x32xf32>
    %203 = tpu.matmul %194, %202, %cst_128 {dimension_numbers = #tpu.dot_dimension_numbers<[0], [0], [1], [1], [0, 1, 1, 1], [], []>} : vector<8x8xf32>, vector<8x32xf32>, vector<8x32xf32> -> vector<8x32xf32>
    %c0_129 = arith.constant 0 : index
    %c0_130 = arith.constant 0 : index
    %204 = vector.load %arg19[%c0_129, %c0_130] : memref<1x32xf32, #tpu.memory_space<vmem>>, vector<1x32xf32>
    %205 = vector.broadcast %204 : vector<1x32xf32> to vector<8x32xf32>
    %206 = arith.addf %203, %205 : vector<8x32xf32>
    %c0_131 = arith.constant 0 : index
    %c0_132 = arith.constant 0 : index
    %207 = vector.load %arg20[%c0_131, %c0_132] : memref<32x32xf32, #tpu.memory_space<vmem>>, vector<32x32xf32>
    %cst_133 = arith.constant dense<0.000000e+00> : vector<8x32xf32>
    %208 = tpu.matmul %206, %207, %cst_133 {dimension_numbers = #tpu.dot_dimension_numbers<[1], [0], [0], [1], [0, 0, 1, 1], [], []>} : vector<8x32xf32>, vector<32x32xf32>, vector<8x32xf32> -> vector<8x32xf32>
    %cst_134 = arith.constant dense<0.000000e+00> : vector<8x32xf32>
    %209 = tpu.matmul %194, %208, %cst_134 {dimension_numbers = #tpu.dot_dimension_numbers<[0], [0], [1], [1], [0, 1, 1, 1], [], []>} : vector<8x8xf32>, vector<8x32xf32>, vector<8x32xf32> -> vector<8x32xf32>
    %c0_135 = arith.constant 0 : index
    %c0_136 = arith.constant 0 : index
    %210 = vector.load %arg21[%c0_135, %c0_136] : memref<1x32xf32, #tpu.memory_space<vmem>>, vector<1x32xf32>
    %211 = vector.broadcast %210 : vector<1x32xf32> to vector<8x32xf32>
    %212 = arith.addf %209, %211 : vector<8x32xf32>
    %cst_137 = arith.constant dense<0.000000e+00> : vector<32xf32>
    %213 = vector.multi_reduction <add>, %212, %cst_137 [0] : vector<8x32xf32> to vector<32xf32>
    %214 = vector.shape_cast %213 : vector<32xf32> to vector<1x32xf32>
    %cst_138 = arith.constant 8.000000e+00 : f32
    %215 = vector.broadcast %cst_138 : f32 to vector<1x32xf32>
    %216 = arith.divf %214, %215 : vector<1x32xf32>
    %c0_139 = arith.constant 0 : index
    %c0_140 = arith.constant 0 : index
    %217 = vector.load %arg16[%c0_139, %c0_140] : memref<4x32xf32, #tpu.memory_space<vmem>>, vector<4x32xf32>
    %cst_141 = arith.constant dense<0.000000e+00> : vector<8x32xf32>
    %218 = tpu.matmul %35, %217, %cst_141 {dimension_numbers = #tpu.dot_dimension_numbers<[1], [0], [0], [1], [0, 0, 1, 1], [], []>} : vector<8x4xf32>, vector<4x32xf32>, vector<8x32xf32> -> vector<8x32xf32>
    %cst_142 = arith.constant dense<0.000000e+00> : vector<8x32xf32>
    %219 = tpu.matmul %194, %218, %cst_142 {dimension_numbers = #tpu.dot_dimension_numbers<[0], [0], [1], [1], [0, 1, 1, 1], [], []>} : vector<8x8xf32>, vector<8x32xf32>, vector<8x32xf32> -> vector<8x32xf32>
    %c0_143 = arith.constant 0 : index
    %c0_144 = arith.constant 0 : index
    %220 = vector.load %arg17[%c0_143, %c0_144] : memref<1x32xf32, #tpu.memory_space<vmem>>, vector<1x32xf32>
    %221 = vector.broadcast %220 : vector<1x32xf32> to vector<8x32xf32>
    %222 = arith.addf %219, %221 : vector<8x32xf32>
    %c0_145 = arith.constant 0 : index
    %c0_146 = arith.constant 0 : index
    %223 = vector.load %arg18[%c0_145, %c0_146] : memref<32x32xf32, #tpu.memory_space<vmem>>, vector<32x32xf32>
    %cst_147 = arith.constant dense<0.000000e+00> : vector<8x32xf32>
    %224 = tpu.matmul %222, %223, %cst_147 {dimension_numbers = #tpu.dot_dimension_numbers<[1], [0], [0], [1], [0, 0, 1, 1], [], []>} : vector<8x32xf32>, vector<32x32xf32>, vector<8x32xf32> -> vector<8x32xf32>
    %cst_148 = arith.constant dense<0.000000e+00> : vector<8x32xf32>
    %225 = tpu.matmul %194, %224, %cst_148 {dimension_numbers = #tpu.dot_dimension_numbers<[0], [0], [1], [1], [0, 1, 1, 1], [], []>} : vector<8x8xf32>, vector<8x32xf32>, vector<8x32xf32> -> vector<8x32xf32>
    %c0_149 = arith.constant 0 : index
    %c0_150 = arith.constant 0 : index
    %226 = vector.load %arg19[%c0_149, %c0_150] : memref<1x32xf32, #tpu.memory_space<vmem>>, vector<1x32xf32>
    %227 = vector.broadcast %226 : vector<1x32xf32> to vector<8x32xf32>
    %228 = arith.addf %225, %227 : vector<8x32xf32>
    %c0_151 = arith.constant 0 : index
    %c0_152 = arith.constant 0 : index
    %229 = vector.load %arg20[%c0_151, %c0_152] : memref<32x32xf32, #tpu.memory_space<vmem>>, vector<32x32xf32>
    %cst_153 = arith.constant dense<0.000000e+00> : vector<8x32xf32>
    %230 = tpu.matmul %228, %229, %cst_153 {dimension_numbers = #tpu.dot_dimension_numbers<[1], [0], [0], [1], [0, 0, 1, 1], [], []>} : vector<8x32xf32>, vector<32x32xf32>, vector<8x32xf32> -> vector<8x32xf32>
    %cst_154 = arith.constant dense<0.000000e+00> : vector<8x32xf32>
    %231 = tpu.matmul %194, %230, %cst_154 {dimension_numbers = #tpu.dot_dimension_numbers<[0], [0], [1], [1], [0, 1, 1, 1], [], []>} : vector<8x8xf32>, vector<8x32xf32>, vector<8x32xf32> -> vector<8x32xf32>
    %c0_155 = arith.constant 0 : index
    %c0_156 = arith.constant 0 : index
    %232 = vector.load %arg21[%c0_155, %c0_156] : memref<1x32xf32, #tpu.memory_space<vmem>>, vector<1x32xf32>
    %233 = vector.broadcast %232 : vector<1x32xf32> to vector<8x32xf32>
    %234 = arith.addf %231, %233 : vector<8x32xf32>
    %cst_157 = arith.constant dense<0.000000e+00> : vector<32xf32>
    %235 = vector.multi_reduction <add>, %234, %cst_157 [0] : vector<8x32xf32> to vector<32xf32>
    %236 = vector.shape_cast %235 : vector<32xf32> to vector<1x32xf32>
    %cst_158 = arith.constant 8.000000e+00 : f32
    %237 = vector.broadcast %cst_158 : f32 to vector<1x32xf32>
    %238 = arith.divf %236, %237 : vector<1x32xf32>
    %239 = tpu.concatenate %216, %238 in 0 : vector<1x32xf32>, vector<1x32xf32> -> vector<2x32xf32>
    %c0_159 = arith.constant 0 : index
    %c0_160 = arith.constant 0 : index
    %240 = vector.load %arg22[%c0_159, %c0_160] : memref<32x4xf32, #tpu.memory_space<vmem>>, vector<32x4xf32>
    %cst_161 = arith.constant dense<0.000000e+00> : vector<2x4xf32>
    %241 = tpu.matmul %176, %240, %cst_161 {dimension_numbers = #tpu.dot_dimension_numbers<[1], [0], [0], [1], [0, 0, 1, 1], [], []>} : vector<2x32xf32>, vector<32x4xf32>, vector<2x4xf32> -> vector<2x4xf32>
    %c0_162 = arith.constant 0 : index
    %c0_163 = arith.constant 0 : index
    %242 = vector.load %arg23[%c0_162, %c0_163] : memref<32x4xf32, #tpu.memory_space<vmem>>, vector<32x4xf32>
    %cst_164 = arith.constant dense<0.000000e+00> : vector<2x4xf32>
    %243 = tpu.matmul %239, %242, %cst_164 {dimension_numbers = #tpu.dot_dimension_numbers<[1], [0], [0], [1], [0, 0, 1, 1], [], []>} : vector<2x32xf32>, vector<32x4xf32>, vector<2x4xf32> -> vector<2x4xf32>
    %244 = arith.addf %241, %243 : vector<2x4xf32>
    %c0_165 = arith.constant 0 : index
    %c0_166 = arith.constant 0 : index
    %245 = vector.load %arg24[%c0_165, %c0_166] : memref<1x4xf32, #tpu.memory_space<vmem>>, vector<1x4xf32>
    %246 = vector.broadcast %245 : vector<1x4xf32> to vector<2x4xf32>
    %247 = arith.addf %244, %246 : vector<2x4xf32>
    %c0_167 = arith.constant 0 : index
    %c0_168 = arith.constant 0 : index
    %248 = vector.load %arg3[%c0_167, %c0_168] : memref<2x8xf32, #tpu.memory_space<vmem>>, vector<2x8xf32>
    %c0_169 = arith.constant 0 : index
    %c0_170 = arith.constant 0 : index
    %249 = vector.load %arg25[%c0_169, %c0_170] : memref<8x4xf32, #tpu.memory_space<vmem>>, vector<8x4xf32>
    %cst_171 = arith.constant dense<0.000000e+00> : vector<2x4xf32>
    %250 = tpu.matmul %248, %249, %cst_171 {dimension_numbers = #tpu.dot_dimension_numbers<[1], [0], [0], [1], [0, 0, 1, 1], [], []>} : vector<2x8xf32>, vector<8x4xf32>, vector<2x4xf32> -> vector<2x4xf32>
    %c0_172 = arith.constant 0 : index
    %c0_173 = arith.constant 0 : index
    %251 = vector.load %arg26[%c0_172, %c0_173] : memref<1x4xf32, #tpu.memory_space<vmem>>, vector<1x4xf32>
    %252 = vector.broadcast %251 : vector<1x4xf32> to vector<2x4xf32>
    %253 = arith.addf %250, %252 : vector<2x4xf32>
    %c0_174 = arith.constant 0 : index
    %c0_175 = arith.constant 0 : index
    %254 = vector.load %arg27[%c0_174, %c0_175] : memref<4x16xf32, #tpu.memory_space<vmem>>, vector<4x16xf32>
    %cst_176 = arith.constant dense<0.000000e+00> : vector<2x16xf32>
    %255 = tpu.matmul %247, %254, %cst_176 {dimension_numbers = #tpu.dot_dimension_numbers<[1], [0], [0], [1], [0, 0, 1, 1], [], []>} : vector<2x4xf32>, vector<4x16xf32>, vector<2x16xf32> -> vector<2x16xf32>
    %c0_177 = arith.constant 0 : index
    %c0_178 = arith.constant 0 : index
    %256 = vector.load %arg28[%c0_177, %c0_178] : memref<4x16xf32, #tpu.memory_space<vmem>>, vector<4x16xf32>
    %cst_179 = arith.constant dense<0.000000e+00> : vector<2x16xf32>
    %257 = tpu.matmul %253, %256, %cst_179 {dimension_numbers = #tpu.dot_dimension_numbers<[1], [0], [0], [1], [0, 0, 1, 1], [], []>} : vector<2x4xf32>, vector<4x16xf32>, vector<2x16xf32> -> vector<2x16xf32>
    %258 = arith.addf %255, %257 : vector<2x16xf32>
    %c0_180 = arith.constant 0 : index
    %c0_181 = arith.constant 0 : index
    %259 = vector.load %arg29[%c0_180, %c0_181] : memref<1x16xf32, #tpu.memory_space<vmem>>, vector<1x16xf32>
    %260 = vector.broadcast %259 : vector<1x16xf32> to vector<2x16xf32>
    %261 = arith.addf %258, %260 : vector<2x16xf32>
    %c0_182 = arith.constant 0 : index
    %c0_183 = arith.constant 0 : index
    %262 = vector.load %arg30[%c0_182, %c0_183] : memref<16x8xf32, #tpu.memory_space<vmem>>, vector<16x8xf32>
    %cst_184 = arith.constant dense<0.000000e+00> : vector<2x8xf32>
    %263 = tpu.matmul %261, %262, %cst_184 {dimension_numbers = #tpu.dot_dimension_numbers<[1], [0], [0], [1], [0, 0, 1, 1], [], []>} : vector<2x16xf32>, vector<16x8xf32>, vector<2x8xf32> -> vector<2x8xf32>
    %c0_185 = arith.constant 0 : index
    %c0_186 = arith.constant 0 : index
    %264 = vector.load %arg31[%c0_185, %c0_186] : memref<1x8xf32, #tpu.memory_space<vmem>>, vector<1x8xf32>
    %265 = vector.broadcast %264 : vector<1x8xf32> to vector<2x8xf32>
    %266 = arith.addf %263, %265 : vector<2x8xf32>
    %c0_187 = arith.constant 0 : index
    %c0_188 = arith.constant 0 : index
    %267 = vector.load %arg32[%c0_187, %c0_188] : memref<8x1xf32, #tpu.memory_space<vmem>>, vector<8x1xf32>
    %cst_189 = arith.constant dense<0.000000e+00> : vector<2x1xf32>
    %268 = tpu.matmul %266, %267, %cst_189 {dimension_numbers = #tpu.dot_dimension_numbers<[1], [0], [0], [1], [0, 0, 1, 1], [], []>} : vector<2x8xf32>, vector<8x1xf32>, vector<2x1xf32> -> vector<2x1xf32>
    %c0_190 = arith.constant 0 : index
    %c0_191 = arith.constant 0 : index
    %269 = vector.load %arg33[%c0_190, %c0_191] : memref<1x1xf32, #tpu.memory_space<vmem>>, vector<1x1xf32>
    %270 = vector.broadcast %269 : vector<1x1xf32> to vector<2x1xf32>
    %271 = arith.addf %268, %270 : vector<2x1xf32>
    %c0_192 = arith.constant 0 : index
    %c0_193 = arith.constant 0 : index
    %272 = vector.load %arg34[%c0_192, %c0_193] : memref<2x1xf32, #tpu.memory_space<vmem>>, vector<2x1xf32>
    tpu.vector_store %arg34[%c0_192, %c0_193], %271 {strides = array<i32>} : memref<2x1xf32, #tpu.memory_space<vmem>>, vector<2x1xf32>,
    %c0_194 = arith.constant 0 : index
    %c0_195 = arith.constant 0 : index
    %273 = vector.load %arg35[%c0_194, %c0_195] : memref<4x4xf32, #tpu.memory_space<vmem>>, vector<4x4xf32>
    tpu.vector_store %arg35[%c0_194, %c0_195], %74 {strides = array<i32>} : memref<4x4xf32, #tpu.memory_space<vmem>>, vector<4x4xf32>,
    %c0_196 = arith.constant 0 : index
    %c0_197 = arith.constant 0 : index
    %274 = vector.load %arg36[%c0_196, %c0_197] : memref<8x8xf32, #tpu.memory_space<vmem>>, vector<8x8xf32>
    tpu.vector_store %arg36[%c0_196, %c0_197], %113 {strides = array<i32>} : memref<8x8xf32, #tpu.memory_space<vmem>>, vector<8x8xf32>,
    return
  }
  func.func @transform_0(%arg0: i32) -> (i32, i32, i32) {
    %c0_i32 = arith.constant 0 : i32
    %c0_i32_0 = arith.constant 0 : i32
    %c0_i32_1 = arith.constant 0 : i32
    %c0_i32_2 = arith.constant 0 : i32
    return %c0_i32, %c0_i32_0, %c0_i32_1 : i32, i32, i32
  }
  func.func @transform_1(%arg0: i32) -> (i32, i32, i32) {
    %c0_i32 = arith.constant 0 : i32
    %c0_i32_0 = arith.constant 0 : i32
    %c0_i32_1 = arith.constant 0 : i32
    %c0_i32_2 = arith.constant 0 : i32
    return %c0_i32, %c0_i32_0, %c0_i32_1 : i32, i32, i32
  }
  func.func @transform_2(%arg0: i32) -> (i32, i32) {
    %c0_i32 = arith.constant 0 : i32
    %c0_i32_0 = arith.constant 0 : i32
    %c0_i32_1 = arith.constant 0 : i32
    return %c0_i32, %c0_i32_0 : i32, i32
  }
  func.func @transform_3(%arg0: i32) -> (i32, i32, i32) {
    %c0_i32 = arith.constant 0 : i32
    %c0_i32_0 = arith.constant 0 : i32
    %c0_i32_1 = arith.constant 0 : i32
    %c0_i32_2 = arith.constant 0 : i32
    return %c0_i32, %c0_i32_0, %c0_i32_1 : i32, i32, i32
  }
  func.func @transform_4(%arg0: i32) -> (i32, i32) {
    %c0_i32 = arith.constant 0 : i32
    %c0_i32_0 = arith.constant 0 : i32
    %c0_i32_1 = arith.constant 0 : i32
    return %c0_i32, %c0_i32_0 : i32, i32
  }
  func.func @transform_5(%arg0: i32) -> (i32, i32) {
    %c0_i32 = arith.constant 0 : i32
    %c0_i32_0 = arith.constant 0 : i32
    %c0_i32_1 = arith.constant 0 : i32
    return %c0_i32, %c0_i32_0 : i32, i32
  }
  func.func @transform_6(%arg0: i32) -> (i32, i32) {
    %c0_i32 = arith.constant 0 : i32
    %c0_i32_0 = arith.constant 0 : i32
    %c0_i32_1 = arith.constant 0 : i32
    return %c0_i32, %c0_i32_0 : i32, i32
  }
  func.func @transform_7(%arg0: i32) -> (i32, i32) {
    %c0_i32 = arith.constant 0 : i32
    %c0_i32_0 = arith.constant 0 : i32
    %c0_i32_1 = arith.constant 0 : i32
    return %c0_i32, %c0_i32_0 : i32, i32
  }
  func.func @transform_8(%arg0: i32) -> (i32, i32) {
    %c0_i32 = arith.constant 0 : i32
    %c0_i32_0 = arith.constant 0 : i32
    %c0_i32_1 = arith.constant 0 : i32
    return %c0_i32, %c0_i32_0 : i32, i32
  }
  func.func @transform_9(%arg0: i32) -> (i32, i32) {
    %c0_i32 = arith.constant 0 : i32
    %c0_i32_0 = arith.constant 0 : i32
    %c0_i32_1 = arith.constant 0 : i32
    return %c0_i32, %c0_i32_0 : i32, i32
  }
  func.func @transform_10(%arg0: i32) -> (i32, i32) {
    %c0_i32 = arith.constant 0 : i32
    %c0_i32_0 = arith.constant 0 : i32
    %c0_i32_1 = arith.constant 0 : i32
    return %c0_i32, %c0_i32_0 : i32, i32
  }
  func.func @transform_11(%arg0: i32) -> (i32, i32) {
    %c0_i32 = arith.constant 0 : i32
    %c0_i32_0 = arith.constant 0 : i32
    %c0_i32_1 = arith.constant 0 : i32
    return %c0_i32, %c0_i32_0 : i32, i32
  }
  func.func @transform_12(%arg0: i32) -> (i32, i32) {
    %c0_i32 = arith.constant 0 : i32
    %c0_i32_0 = arith.constant 0 : i32
    %c0_i32_1 = arith.constant 0 : i32
    return %c0_i32, %c0_i32_0 : i32, i32
  }
  func.func @transform_13(%arg0: i32) -> (i32, i32) {
    %c0_i32 = arith.constant 0 : i32
    %c0_i32_0 = arith.constant 0 : i32
    %c0_i32_1 = arith.constant 0 : i32
    return %c0_i32, %c0_i32_0 : i32, i32
  }
  func.func @transform_14(%arg0: i32) -> (i32, i32) {
    %c0_i32 = arith.constant 0 : i32
    %c0_i32_0 = arith.constant 0 : i32
    %c0_i32_1 = arith.constant 0 : i32
    return %c0_i32, %c0_i32_0 : i32, i32
  }
  func.func @transform_15(%arg0: i32) -> (i32, i32) {
    %c0_i32 = arith.constant 0 : i32
    %c0_i32_0 = arith.constant 0 : i32
    %c0_i32_1 = arith.constant 0 : i32
    return %c0_i32, %c0_i32_0 : i32, i32
  }
  func.func @transform_16(%arg0: i32) -> (i32, i32) {
    %c0_i32 = arith.constant 0 : i32
    %c0_i32_0 = arith.constant 0 : i32
    %c0_i32_1 = arith.constant 0 : i32
    return %c0_i32, %c0_i32_0 : i32, i32
  }
  func.func @transform_17(%arg0: i32) -> (i32, i32) {
    %c0_i32 = arith.constant 0 : i32
    %c0_i32_0 = arith.constant 0 : i32
    %c0_i32_1 = arith.constant 0 : i32
    return %c0_i32, %c0_i32_0 : i32, i32
  }
  func.func @transform_18(%arg0: i32) -> (i32, i32) {
    %c0_i32 = arith.constant 0 : i32
    %c0_i32_0 = arith.constant 0 : i32
    %c0_i32_1 = arith.constant 0 : i32
    return %c0_i32, %c0_i32_0 : i32, i32
  }
  func.func @transform_19(%arg0: i32) -> (i32, i32) {
    %c0_i32 = arith.constant 0 : i32
    %c0_i32_0 = arith.constant 0 : i32
    %c0_i32_1 = arith.constant 0 : i32
    return %c0_i32, %c0_i32_0 : i32, i32
  }
  func.func @transform_20(%arg0: i32) -> (i32, i32) {
    %c0_i32 = arith.constant 0 : i32
    %c0_i32_0 = arith.constant 0 : i32
    %c0_i32_1 = arith.constant 0 : i32
    return %c0_i32, %c0_i32_0 : i32, i32
  }
  func.func @transform_21(%arg0: i32) -> (i32, i32) {
    %c0_i32 = arith.constant 0 : i32
    %c0_i32_0 = arith.constant 0 : i32
    %c0_i32_1 = arith.constant 0 : i32
    return %c0_i32, %c0_i32_0 : i32, i32
  }
  func.func @transform_22(%arg0: i32) -> (i32, i32) {
    %c0_i32 = arith.constant 0 : i32
    %c0_i32_0 = arith.constant 0 : i32
    %c0_i32_1 = arith.constant 0 : i32
    return %c0_i32, %c0_i32_0 : i32, i32
  }
  func.func @transform_23(%arg0: i32) -> (i32, i32) {
    %c0_i32 = arith.constant 0 : i32
    %c0_i32_0 = arith.constant 0 : i32
    %c0_i32_1 = arith.constant 0 : i32
    return %c0_i32, %c0_i32_0 : i32, i32
  }
  func.func @transform_24(%arg0: i32) -> (i32, i32) {
    %c0_i32 = arith.constant 0 : i32
    %c0_i32_0 = arith.constant 0 : i32
    %c0_i32_1 = arith.constant 0 : i32
    return %c0_i32, %c0_i32_0 : i32, i32
  }
  func.func @transform_25(%arg0: i32) -> (i32, i32) {
    %c0_i32 = arith.constant 0 : i32
    %c0_i32_0 = arith.constant 0 : i32
    %c0_i32_1 = arith.constant 0 : i32
    return %c0_i32, %c0_i32_0 : i32, i32
  }
  func.func @transform_26(%arg0: i32) -> (i32, i32) {
    %c0_i32 = arith.constant 0 : i32
    %c0_i32_0 = arith.constant 0 : i32
    %c0_i32_1 = arith.constant 0 : i32
    return %c0_i32, %c0_i32_0 : i32, i32
  }
  func.func @transform_27(%arg0: i32) -> (i32, i32) {
    %c0_i32 = arith.constant 0 : i32
    %c0_i32_0 = arith.constant 0 : i32
    %c0_i32_1 = arith.constant 0 : i32
    return %c0_i32, %c0_i32_0 : i32, i32
  }
  func.func @transform_28(%arg0: i32) -> (i32, i32) {
    %c0_i32 = arith.constant 0 : i32
    %c0_i32_0 = arith.constant 0 : i32
    %c0_i32_1 = arith.constant 0 : i32
    return %c0_i32, %c0_i32_0 : i32, i32
  }
  func.func @transform_29(%arg0: i32) -> (i32, i32) {
    %c0_i32 = arith.constant 0 : i32
    %c0_i32_0 = arith.constant 0 : i32
    %c0_i32_1 = arith.constant 0 : i32
    return %c0_i32, %c0_i32_0 : i32, i32
  }
  func.func @transform_30(%arg0: i32) -> (i32, i32) {
    %c0_i32 = arith.constant 0 : i32
    %c0_i32_0 = arith.constant 0 : i32
    %c0_i32_1 = arith.constant 0 : i32
    return %c0_i32, %c0_i32_0 : i32, i32
  }
  func.func @transform_31(%arg0: i32) -> (i32, i32) {
    %c0_i32 = arith.constant 0 : i32
    %c0_i32_0 = arith.constant 0 : i32
    %c0_i32_1 = arith.constant 0 : i32
    return %c0_i32, %c0_i32_0 : i32, i32
  }
  func.func @transform_32(%arg0: i32) -> (i32, i32) {
    %c0_i32 = arith.constant 0 : i32
    %c0_i32_0 = arith.constant 0 : i32
    %c0_i32_1 = arith.constant 0 : i32
    return %c0_i32, %c0_i32_0 : i32, i32
  }
  func.func @transform_33(%arg0: i32) -> (i32, i32) {
    %c0_i32 = arith.constant 0 : i32
    %c0_i32_0 = arith.constant 0 : i32
    %c0_i32_1 = arith.constant 0 : i32
    return %c0_i32, %c0_i32_0 : i32, i32
  }
  func.func @transform_34(%arg0: i32) -> (i32, i32) {
    %c0_i32 = arith.constant 0 : i32
    %c0_i32_0 = arith.constant 0 : i32
    %c0_i32_1 = arith.constant 0 : i32
    return %c0_i32, %c0_i32_0 : i32, i32
  }
  func.func @transform_35(%arg0: i32) -> (i32, i32) {
    %c0_i32 = arith.constant 0 : i32
    %c0_i32_0 = arith.constant 0 : i32
    %c0_i32_1 = arith.constant 0 : i32
    return %c0_i32, %c0_i32_0 : i32, i32
  }
}

</mosaic_0001>

<bundles_post_ra>
// kernel: tabular_graph_forward.1
= control target key start
LH: loop header
LB: loop body
LE: loop exit
PB: predicated region body
PF: predicated region fallthrough
CT: control target
= control target key end

     0   :  { %v4154_v0 = vmov 0.0   ;;  %vm4155_vm0 = vmmov 0   ;;  %s4156_s6 = smov 3   ;;  %v4157_v1 = vmov 0   ;;  %s4158_s10 = smov 4   ;;  %vm156_vm1 = vcmask 1043456   ;;  %s4621_s0 = inlined_call_operand.smem [shape: u32[36], index: -1, kind: input, shape index: {}] }
   0x1   :  { %s1_s5 = sld [smem:[%s4621_s0]]   ;;  %3826 = vmatprep.subr.mxu1 %v4154_v0  ;;  %3828 = vmatprep.mubr.msk.f32.mxu1 %vm4155_vm0, %v4154_v0  ;;  %s4159_s14 = smov 6   ;;  %vm152_vm2 = vcmask 31744   ;;  %vm478_vm3 = vcmask 64512   ;;  %vm556_vm4 = vcmask 27648   ;;  %vm1175_vm7 = vcmask 261120  }
   0x2   :  { %3821 = vmatprep.subr.mxu0 %v4154_v0  ;;  %s4209_s9 = sld [smem:[%s4621_s0 + %s4156_s6]]   ;;  %3823 = vmatprep.mubr.msk.f32.mxu0 %vm4155_vm0, %v4154_v0  ;;  %s4160_s18 = smov 5   ;;  %vm1486_vm8 = vcmask 257024   ;;  %vm1942_vm9 = vcmask 1040384   ;;  %vm3428_vm12 = vcmask 130048   ;;  %vm3583_vm13 = vcmask 1024  }
   0x3   :  { %4128 = vset.pattern.permute.xlu1 %v4157_v1  ;;  %s3602_s13 = sld [smem:[%s4621_s0 + %s4158_s10]]   ;;  %4129 = vset.pattern.permute.xlu0 %v4157_v1  ;;  %s4161_s22 = smov 127  }
   0x4   :  { %s3604_s17 = sld [smem:[%s4621_s0 + %s4159_s14]]   ;;  %s4162_s23 = smov 8  }
   0x5   :  { %s3603_s21 = sld [smem:[%s4621_s0 + %s4160_s18]]   ;;  %s4163_s27 = smov 7  }
   0x6   :  { %s3606_s26 = sld [smem:[%s4621_s0 + %s4162_s23]]   ;;  %s4164_s1 = smov 1  }
   0x7   :  { %v145_v2 = vld [vmem:[%s1_s5] sm:$0xf]  ;;  %v3639_v4 = vld [vmem:[%s1_s5 + $0x4] sm:$0xf]  ;;  %s3605_s30 = sld [smem:[%s4621_s0 + %s4163_s27]]   ;;  %s4165_s5 = smov 9  }
   0x8   :  { %150 = vrot.lane.b32.xlu0 %v145_v2, %s4161_s22  ;;  %3827 = vmatpush3.msk.msra.mxu1 %vm156_vm1, %v145_v2  ;;  %v146_v3 = vld [vmem:[%s4209_s9] sm:$0xf]  ;;  %v3634_v8 = vld [vmem:[%s4209_s9 + $0x4] sm:$0xf]  ;;  %s3599_s4 = sld [smem:[%s4621_s0 + %s4164_s1]]   ;;  %s4166_s9 = smov 34  }
   0x9   :  { %3829 = vmatmul.mubr.msk.f32.vlgmr.msra.gmra.mxu1 %vm152_vm2, %v146_v3  ;;  %3836 = vmatprep.subr.mxu1 %v4154_v0  ;;  %v304_v5 = vld [vmem:[%s3602_s13] sm:$0xf]  ;;  %s3607_s8 = sld [smem:[%s4621_s0 + %s4165_s5]]   ;;  %s4168_s13 = smov 11  }
   0xa   :  { %3837 = vmatpush3.msk.msra.mxu1 %vm156_vm1, %v3639_v4  ;;  %3838 = vmatprep.mubr.msk.f32.mxu1 %vm4155_vm0, %v4154_v0  ;;  %v471_v6 = vld [vmem:[%s3604_s17] sm:$0xf]  ;;  %s3632_s12 = sld [smem:[%s4621_s0 + %s4166_s9]]   ;;  %s4169_s17 = smov 10  }
   0xb   :  { %307 = vperm.xlu1 %4128, %v304_v5   ;;  %3846 = vmatprep.subr.mxu1 %v4154_v0  ;;  %v464_v7 = vld [vmem:[%s3603_s21] sm:$0xf]  ;;  %s3609_s16 = sld [smem:[%s4621_s0 + %s4168_s13]]   ;;  %s4170_s21 = smov 35  }
   0xc   :  { %314 = vrot.lane.b32.xlu0 %v3639_v4, %s4161_s22  ;;  %v667_v48 = vld [vmem:[%s3606_s26] sm:$0xff]  ;;  %s3608_s20 = sld [smem:[%s4621_s0 + %s4169_s17]]   ;;  %s4171_s25 = smov 13  }
   0xd   :  { %3839 = vmatmul.mubr.msk.f32.vlgmr.msra.gmra.mxu1 %vm152_vm2, %v146_v3  ;;  %v660_v49 = vld [vmem:[%s3605_s30] sm:$0xff]  ;;  %v4167_v3 = vmov 1.0   ;;  %s3633_s24 = sld [smem:[%s4621_s0 + %s4170_s21]]   ;;  %s4172_s29 = smov 12  }
   0xe   :  { %3848 = vmatprep.mubr.msk.f32.mxu1 %vm4155_vm0, %v4154_v0  ;;  %v4275_v51 = vld [vmem:[%s3599_s4] sm:$0xff]  ;;  %v4277_v52 = vld [vmem:[%s3599_s4 + $0x8] sm:$0xff]  ;;  %s3611_s28 = sld [smem:[%s4621_s0 + %s4171_s25]]   ;;  %s4173_s3 = smov 15  }
   0xf   :  { %474 = vperm.xlu1 %4128, %v471_v6   ;;  %v4290_v60 = vld [vmem:[%s3607_s8] sm:$0xff]  ;;  %s3610_s2 = sld [smem:[%s4621_s0 + %s4172_s29]]   ;;  %s4174_s7 = smov 14  }
  0x10   :  { %467 = vperm.xlu0 %4129, %v464_v7   ;;  %s3613_s6 = sld [smem:[%s4621_s0 + %s4173_s3]]   ;;  %s4175_s11 = smov 17  }
  0x11   :  { %s3612_s10 = sld [smem:[%s4621_s0 + %s4174_s7]]   ;;  %s4176_s15 = smov 16  }
  0x12   :  { %s3615_s14 = sld [smem:[%s4621_s0 + %s4175_s11]]   ;;  %s4177_s19 = smov 19  }
  0x13   :  { %s3614_s18 = sld [smem:[%s4621_s0 + %s4176_s15]]   ;;  %s4178_s23 = smov 18  }
  0x14   :  { %s3617_s22 = sld [smem:[%s4621_s0 + %s4177_s19]]   ;;  %s4179_s27 = smov 21  }
  0x15   :  { %s3616_s26 = sld [smem:[%s4621_s0 + %s4178_s23]]   ;;  %s4180_s1 = smov 22  }
  0x16   :  { %s3619_s30 = sld [smem:[%s4621_s0 + %s4179_s27]]   ;;  %s4181_s5 = smov 20  }
  0x17   :  { %s3620_s4 = sld [smem:[%s4621_s0 + %s4180_s1]]   ;;  %s4182_s9 = smov 24  }
  0x18   :  { %s3618_s8 = sld [smem:[%s4621_s0 + %s4181_s5]]   ;;  %s4183_s13 = smov 2  }
  0x19   :  { %s4184_s17 = smov 26   ;;  %s4185_s21 = smov 27  }
  0x1a   :  { %s4186_s25 = smov 23   ;;  %s4187_s29 = smov 25  }
  0x1b   :  { %s4188_s3 = smov 29   ;;  %s4189_s7 = smov 28  }
  0x1c   :  { %s4190_s11 = smov 31   ;;  %s4191_s15 = smov 32  }
  0x1d   :  { %s4192_s19 = smov 30   ;;  %s4193_s23 = smov 33  }
  0x7a   :  { %v151_v9 = vpop.permute.xlu0 %150 }
  0x7b   :  { %3822 = vmatpush3.msk.msra.mxu0 %vm156_vm1, %v151_v9 }
  0x7c   :  { %3824 = vmatmul.mubr.msk.f32.vlgmr.msra.gmra.mxu0 %vm152_vm2, %v3634_v8  ;;  %3831 = vmatprep.subr.mxu0 %v4154_v0 }
  0x7d   :  { %3833 = vmatprep.mubr.msk.f32.mxu0 %vm4155_vm0, %v4154_v0 }
  0x7e   :  { %v315_v10 = vpop.permute.xlu0 %314 }
  0x7f   :  { %3832 = vmatpush3.msk.msra.mxu0 %vm156_vm1, %v315_v10 }
  0x80   :  { %3834 = vmatmul.mubr.msk.f32.vlgmr.msra.gmra.mxu0 %vm152_vm2, %v3634_v8  ;;  %3841 = vmatprep.subr.mxu0 %v4154_v0 }
  0x81   :  { %3843 = vmatprep.mubr.msk.f32.mxu0 %vm4155_vm0, %v4154_v0 }
  0x86   :  { %v308_v15 = vpop.permute.xlu1 %307 }
  0x8a   :  { %v475_v19 = vpop.permute.xlu1 %474 }
  0x8b   :  { %v468_v24 = vpop.permute.xlu0 %467 }
  0xc9   :  { %v300_v11 = vpop.f32.mrf.mxu1 }
  0xcb   :  { %v3830_v12 = vpop.f32.mrf.mxu1 }
  0xcd   :  { %v456_v13 = vpop.f32.mrf.mxu1 }
  0xcf   :  { %v3840_v14 = vpop.f32.mrf.mxu1 }
 0x13c   :  { %v225_v16 = vpop.f32.mrf.mxu0 }
 0x13d   :  { %v301_v17 = vadd.f32 %v300_v11, %v225_v16 }
 0x13e   :  { %v3825_v18 = vpop.f32.mrf.mxu0 }
 0x13f   :  { %v4244_v20 = vadd.f32 %v308_v15, %v301_v17 }
 0x140   :  { %v384_v21 = vpop.f32.mrf.mxu0 }
 0x141   :  { %v477_v22 = vmul.f32 %v475_v19, %v4244_v20  ;;  %v457_v23 = vadd.f32 %v456_v13, %v384_v21  ;;  %v470_v27 = vmul.f32 %v468_v24, %v4244_v20 }
 0x142   :  { %v3835_v25 = vpop.f32.mrf.mxu0 }
 0x143   :  { %v4247_v26 = vadd.f32 %v457_v23, %v308_v15  ;;  %3842 = vmatpush3.xpose.msk.msra.mxu0 %vm478_vm3, %v477_v22 }
 0x144   :  { %3851 = vmatprep.subr.mxu0 %v4154_v0 }
 0x145   :  { %v569_v28 = vmul.f32 %v475_v19, %v4247_v26  ;;  %v568_v29 = vmul.f32 %v468_v24, %v4247_v26 }
 0x146   :  { %3844 = vmatmul.mubr.msk.f32.vlgmr.msra.gmra.mxu0 %vm478_vm3, %v470_v27 }
 0x147   :  { %3847 = vmatpush3.xpose.msk.msra.mxu1 %vm478_vm3, %v569_v28  ;;  %3853 = vmatprep.mubr.msk.f32.mxu0 %vm4155_vm0, %v4154_v0 }
 0x148   :  { %3856 = vmatprep.subr.mxu1 %v4154_v0 }
 0x14a   :  { %3849 = vmatmul.mubr.msk.f32.vlgmr.msra.gmra.mxu1 %vm478_vm3, %v568_v29 }
 0x14b   :  { %3858 = vmatprep.mubr.msk.f32.mxu1 %vm4155_vm0, %v4154_v0 }
 0x206   :  { %v551_v30 = vpop.f32.mrf.mxu0 }
 0x207   :  { %v555_v31 = vmul.f32 0.35355338, %v551_v30 }
 0x208   :  { %v3845_v32 = vpop.f32.mrf.mxu0 }
 0x209   :  { %v557_v33 = vsel %vm556_vm4, %v555_v31, -inf }
 0x20a   :  { %558 = vmax.xlane.f32.xlu1 %v557_v33  ;;  %v642_v34 = vpop.f32.mrf.mxu1 }
 0x20b   :  { %v646_v35 = vmul.f32 0.35355338, %v642_v34 }
 0x20c   :  { %v3850_v36 = vpop.f32.mrf.mxu1 }
 0x20d   :  { %v647_v37 = vsel %vm556_vm4, %v646_v35, -inf }
 0x20e   :  { %648 = vmax.xlane.f32.xlu0 %v647_v37 }
 0x293   :  { %v559_v38 = vpop.xlane.xlu1 %558 }
 0x294   :  { %v560_v39 = vsub.f32 %v555_v31, %v559_v38  ;;  %v4323_v38 = vld [vmem:[%s3609_s16 + $0x18] sm:$0xff] }
 0x296   :  { %v561_v40 = vmul.f32 1.442695, %v560_v39  ;;  %v4325_v39 = vld [vmem:[%s3609_s16 + $0x10] sm:$0xff] }
 0x297   :  { %v649_v41 = vpop.xlane.xlu0 %648 }
 0x298   :  { %4130 = vpow2.f32 %v561_v40  ;;  %v650_v42 = vsub.f32 %v646_v35, %v649_v41 }
 0x29a   :  { %v651_v43 = vmul.f32 1.442695, %v650_v42 }
 0x29c   :  { %4132 = vpow2.f32 %v651_v43 }
 0x2a5   :  { %v4131_v44 = vpop.eup %4130 }
 0x2a6   :  { %v563_v45 = vsel %vm556_vm4, %v4131_v44, 0.0 }
 0x2a7   :  { %564 = vadd.xlane.f32.xlu1 %v563_v45  ;;  %v4341_v45 = vld [vmem:[%s3609_s16] sm:$0xff] }
 0x2a9   :  { %v4133_v46 = vpop.eup %4132 }
 0x2aa   :  { %v653_v47 = vsel %vm556_vm4, %v4133_v46, 0.0 }
 0x2ab   :  { %654 = vadd.xlane.f32.xlu0 %v653_v47 }
 0x2b8   :  { %670 = vperm.xlu1 %4128, %v667_v48   ;;  %v4349_v48 = vld [vmem:[%s3608_s20] ss:$0 sm:$0xff]  ;;  %s3624_s20 = sld [smem:[%s4621_s0 + %s4184_s17]]  }
 0x2c1   :  { %663 = vperm.xlu0 %4129, %v660_v49  }
 0x330   :  { %v565_v50 = vpop.xlane.xlu1 %564 }
 0x331   :  { %4134 = vrcp.f32 %v565_v50 }
 0x334   :  { %v671_v53 = vpop.permute.xlu1 %670  ;;  %v655_v54 = vpop.xlane.xlu0 %654 }
 0x335   :  { %v673_v55 = vmul.f32 %v671_v53, %v4275_v51  ;;  %v763_v56 = vmul.f32 %v4277_v52, %v671_v53  ;;  %4136 = vrcp.f32 %v655_v54 }
 0x337   :  { %3852 = vmatpush3.xpose.msk.msra.mxu0 %vm152_vm2, %v673_v55  ;;  %3857 = vmatpush3.xpose.msk.msra.mxu1 %vm152_vm2, %v763_v56 }
 0x338   :  { %3866 = vmatprep.subr.mxu1 %v4154_v0  ;;  %3861 = vmatprep.subr.mxu0 %v4154_v0 }
 0x33c   :  { %v664_v57 = vpop.permute.xlu0 %663 }
 0x33d   :  { %v666_v58 = vmul.f32 %v664_v57, %v4275_v51  ;;  %v762_v59 = vmul.f32 %v4277_v52, %v664_v57 }
 0x33e   :  { %v4135_v61 = vpop.eup %4134 }
 0x33f   :  { %3854 = vmatmul.mubr.msk.f32.vlgmr.msra.gmra.mxu0 %vm152_vm2, %v666_v58  ;;  %3859 = vmatmul.mubr.msk.f32.vlgmr.msra.gmra.mxu1 %vm152_vm2, %v762_v59  ;;  %v567_v63 = vmul.f32 %v4135_v61, %v4131_v44  ;;  %v4337_v44 = vld [vmem:[%s3609_s16 + $0x8] sm:$0xff]  ;;  %s3600_s16 = sld [smem:[%s4621_s0 + %s4183_s13]]  }
 0x340   :  { %3867 = vmatpush3.msra.mxu1 %v4290_v60  ;;  %3868 = vmatprep.mubr.msk.f32.mxu1 %vm4155_vm0, %v4154_v0 }
 0x341   :  { %3863 = vmatprep.mubr.msk.f32.mxu0 %vm4155_vm0, %v4154_v0  ;;  %3876 = vmatprep.subr.mxu1 %v4154_v0 }
 0x342   :  { %v4137_v62 = vpop.eup %4136  ;;  %3862 = vmatpush3.msk.msra.mxu0 %vm156_vm1, %v4167_v3 }
 0x343   :  { %3869 = vmatmul.mubr.msk.f32.vlgmr.msra.gmra.mxu1 %vm478_vm3, %v4244_v20  ;;  %v657_v1 = vmul.f32 %v4137_v62, %v4133_v46  ;;  %3871 = vmatprep.subr.mxu0 %v4154_v0 }
 0x344   :  { %3884 = vmatprep.mubr.msk.f32.mxu1 %vm4155_vm0, %v4154_v0  ;;  %3877 = vmatpush3.msra.mxu1 %v4323_v38 }
 0x345   :  { %v658_v2 = vadd.f32 %v657_v1, %v567_v63  ;;  %3878 = vmatprep.subr.mxu1 %v4154_v0  ;;  %v1332_v1 = vld [vmem:[%s3611_s28 + $0x18] sm:$0xff] }
 0x346   :  { %3879 = vmatpush3.msra.mxu1 %v4325_v39 }
 0x347   :  { %v659_v4 = vmul.f32 0.5, %v658_v2  ;;  %3880 = vmatprep.subr.mxu1 %v4154_v0 }
 0x348   :  { %3881 = vmatpush3.msra.mxu1 %v4337_v44 }
 0x349   :  { %861 = vxpose.xlu1.b32.start.end [1/1] (short) (narrow) %v659_v4, 8  ;;  %3585 = vst.msk [vmem:[%s3632_s12] sm:$0xf] %vm556_vm4, %v659_v4  ;;  %v854_v23 = vsel %vm556_vm4, %v659_v4, 0.0  ;;  %3882 = vmatprep.subr.mxu1 %v4154_v0  ;;  %s3622_s12 = sld [smem:[%s4621_s0 + %s4182_s9]]  }
 0x34a   :  { %v855_v24 = vrot.slane %v854_v23, 4  ;;  %3883 = vmatpush3.msra.mxu1 %v4341_v45 }
 0x34b   :  { %3903 = vmatprep.subr.mxu1 %v4154_v0 }
 0x34c   :  { %v856_v25 = vadd.f32 %v855_v24, %v854_v23 }
 0x34e   :  { %v857_v27 = vrot.slane %v856_v25, 2 }
 0x350   :  { %v858_v28 = vadd.f32 %v857_v27, %v856_v25  ;;  %v4439_v27 = vld [vmem:[%s3613_s6] sm:$0xf]  ;;  %s3627_s6 = sld [smem:[%s4621_s0 + %s4188_s3]]  }
 0x352   :  { %v859_v29 = vrot.slane %v858_v28, 1 }
 0x354   :  { %v860_v30 = vadd.f32 %v859_v29, %v858_v28 }
 0x356   :  { %vm969_vm6 = vcmp.gt.f32.partialorder %v860_v30, 0.0 }
 0x3c5   :  { %v877_v5 = vpop.trf.xlu1 }
 0x3c6   :  { %3864 = vmatmul.mubr.msk.f32.vlgmr.msra.gmra.mxu0 %vm152_vm2, %v877_v5  ;;  %v1330_v5 = vld [vmem:[%s3611_s28 + $0x8] sm:$0xff] }
 0x3c7   :  { %3873 = vmatprep.mubr.msk.f32.mxu0 %vm4155_vm0, %v4154_v0 }
 0x3ff   :  { %v746_v6 = vpop.f32.mrf.mxu0  ;;  %v836_v7 = vpop.f32.mrf.mxu1 }
 0x400   :  { %v750_v8 = vmul.f32 0.5, %v746_v6  ;;  %v840_v36 = vmul.f32 0.5, %v836_v7  ;;  %v1329_v6 = vld [vmem:[%s3611_s28] sm:$0xff] }
 0x401   :  { %v3855_v9 = vpop.f32.mrf.mxu0  ;;  %v3860_v10 = vpop.f32.mrf.mxu1  ;;  %v3660_v7 = vld [vmem:[%s3610_s2] ss:$0 sm:$0xff]  ;;  %s3623_s2 = sld [smem:[%s4621_s0 + %s4187_s29]]  }
 0x402   :  { %v751_v11 = vsel %vm478_vm3, %v750_v8, -inf  ;;  %v841_v37 = vsel %vm478_vm3, %v840_v36, -inf }
 0x403   :  { %752 = vmax.xlane.f32.xlu1 %v751_v11  ;;  %v1052_v12 = vpop.f32.mrf.mxu1 }
 0x404   :  { %3872 = vmatpush3.msk.msra.mxu0 %vm156_vm1, %v1052_v12 }
 0x405   :  { %v3870_v13 = vpop.f32.mrf.mxu1  ;;  %3887 = vmatprep.subr.mxu0 %v4154_v0 }
 0x486   :  { %v965_v14 = vpop.f32.mrf.mxu0 }
 0x487   :  { %4138 = vrsqrt.f32 %v965_v14  ;;  %vm972_vm5 = vcmp.gt.f32.partialorder %v965_v14, 0.0 }
 0x488   :  { %v3865_v15 = vpop.f32.mrf.mxu0 }
 0x48c   :  { %v753_v16 = vpop.xlane.xlu1 %752 }
 0x48d   :  { %v754_v17 = vsub.f32 %v750_v8, %v753_v16 }
 0x48f   :  { %v755_v18 = vmul.f32 1.442695, %v754_v17 }
 0x491   :  { %4140 = vpow2.f32 %v755_v18 }
 0x492   :  { %4142 = vrsqrt.f32 %v860_v30 }
 0x494   :  { %v4139_v19 = vpop.eup %4138 }
 0x495   :  { %v974_v20 = vsel %vm972_vm5, %v4139_v19, 0.0 }
 0x496   :  { %977 = vperm.xlu0 %4129, %v974_v20  }
 0x49e   :  { %v4141_v21 = vpop.eup %4140 }
 0x49f   :  { %v757_v22 = vsel %vm478_vm3, %v4141_v21, 0.0  ;;  %v4143_v31 = vpop.eup %4142 }
 0x4a0   :  { %758 = vadd.xlane.f32.xlu1 %v757_v22  ;;  %v971_v34 = vsel %vm969_vm6, %v4143_v31, 0.0 }
 0x511   :  { %v978_v32 = vpop.permute.xlu0 %977 }
 0x512   :  { %v980_v33 = vmul.f32 %v978_v32, %v659_v4  ;;  %v1331_v4 = vld [vmem:[%s3611_s28 + $0x10] sm:$0xff]  ;;  %s3621_s28 = sld [smem:[%s4621_s0 + %s4186_s25]]  }
 0x514   :  { %v981_v35 = vmul.f32 %v980_v33, %v971_v34 }
 0x516   :  { %1063 = vxpose.xlu0.b32.start.end [1/1] (short) (narrow) %v981_v35, 8 }
 0x529   :  { %v759_v54 = vpop.xlane.xlu1 %758 }
 0x543   :  { %842 = vmax.xlane.f32.xlu0 %v841_v37 }
 0x592   :  { %v4331_v40 = vpop.trf.xlu0 }
 0x593   :  { %3874 = vmatmul.mubr.msk.f32.vlgmr.msra.gmra.mxu0 %vm152_vm2, %v4331_v40 }
 0x594   :  { %3889 = vmatprep.mubr.msk.f32.mxu0 %vm4155_vm0, %v4154_v0 }
 0x5cc   :  { %v843_v41 = vpop.xlane.xlu0 %842 }
 0x5cd   :  { %v844_v42 = vsub.f32 %v840_v36, %v843_v41 }
 0x5cf   :  { %v845_v43 = vmul.f32 1.442695, %v844_v42 }
 0x5d1   :  { %4144 = vpow2.f32 %v845_v43 }
 0x5d2   :  { %4146 = vrcp.f32 %v759_v54 }
 0x5de   :  { %v4145_v46 = vpop.eup %4144 }
 0x5df   :  { %v847_v47 = vsel %vm478_vm3, %v4145_v46, 0.0  ;;  %v4147_v56 = vpop.eup %4146 }
 0x5e0   :  { %848 = vadd.xlane.f32.xlu1 %v847_v47  ;;  %v761_v58 = vmul.f32 %v4147_v56, %v4141_v21 }
 0x653   :  { %v1167_v49 = vpop.f32.mrf.mxu0 }
 0x654   :  { %v1168_v50 = vadd.f32 %v4349_v48, %v1167_v49 }
 0x655   :  { %v3875_v53 = vpop.f32.mrf.mxu0 }
 0x656   :  { %3885 = vmatmul.mubr.msk.f32.vlgmr.msra.gmra.mxu1 %vm1175_vm7, %v1168_v50 }
 0x657   :  { %3905 = vmatprep.mubr.msk.f32.mxu1 %vm4155_vm0, %v4154_v0 }
 0x669   :  { %v849_v55 = vpop.xlane.xlu1 %848 }
 0x66a   :  { %4148 = vrcp.f32 %v849_v55 }
 0x677   :  { %v4149_v57 = vpop.eup %4148 }
 0x678   :  { %v851_v59 = vmul.f32 %v4149_v57, %v4145_v46 }
 0x67a   :  { %v852_v61 = vadd.f32 %v851_v59, %v761_v58 }
 0x67c   :  { %v4358_v62 = vmul.f32 0.5, %v852_v61 }
 0x67e   :  { %1951 = vxpose.xlu0.b32.start.end [1/1] (short) (narrow) %v4358_v62, 8  ;;  %3586 = vst.msk [vmem:[%s3633_s24] sm:$0xff] %vm478_vm3, %v4358_v62  ;;  %v1944_v56 = vsel %vm478_vm3, %v4358_v62, 0.0  ;;  %s3625_s24 = sld [smem:[%s4621_s0 + %s4185_s21]]  }
 0x67f   :  { %v1945_v57 = vrot.slane %v1944_v56, 4 }
 0x681   :  { %v1946_v58 = vadd.f32 %v1945_v57, %v1944_v56 }
 0x683   :  { %v1947_v59 = vrot.slane %v1946_v58, 2 }
 0x685   :  { %v1948_v61 = vadd.f32 %v1947_v59, %v1946_v58 }
 0x6fa   :  { %v1967_v25 = vpop.trf.xlu0 }
 0x716   :  { %v1245_v63 = vpop.f32.mrf.mxu1 }
 0x717   :  { %3888 = vmatpush3.msk.msra.mxu0 %vm156_vm1, %v1245_v63  ;;  %v1949_v63 = vrot.slane %v1948_v61, 1 }
 0x718   :  { %v3886_v2 = vpop.f32.mrf.mxu1  ;;  %3890 = vmatmul.mubr.msk.f32.vlgmr.msra.gmra.mxu0 %vm152_vm2, %v4331_v40  ;;  %3892 = vmatprep.subr.mxu0 %v4154_v0 }
 0x719   :  { %3893 = vmatpush3.msra.mxu0 %v1332_v1  ;;  %3900 = vmatprep.mubr.msk.f32.mxu0 %vm4155_vm0, %v4154_v0 }
 0x71a   :  { %3894 = vmatprep.subr.mxu0 %v4154_v0 }
 0x71b   :  { %3895 = vmatpush3.msra.mxu0 %v1331_v4 }
 0x71c   :  { %3896 = vmatprep.subr.mxu0 %v4154_v0 }
 0x71d   :  { %3897 = vmatpush3.msra.mxu0 %v1330_v5 }
 0x71e   :  { %3898 = vmatprep.subr.mxu0 %v4154_v0 }
 0x71f   :  { %3899 = vmatpush3.msra.mxu0 %v1329_v6 }
 0x720   :  { %3913 = vmatprep.subr.mxu0 %v4154_v0 }
 0x7d8   :  { %v1325_v8 = vpop.f32.mrf.mxu0 }
 0x7d9   :  { %v1326_v9 = vadd.f32 %v3660_v7, %v1325_v8  ;;  %v2261_v8 = vld [vmem:[%s3615_s14 + $0x18] sm:$0xff] }
 0x7da   :  { %v3891_v10 = vpop.f32.mrf.mxu0 }
 0x7db   :  { %3901 = vmatmul.mubr.msk.f32.vlgmr.msra.gmra.mxu0 %vm1175_vm7, %v1326_v9  ;;  %v2260_v9 = vld [vmem:[%s3615_s14 + $0x10] sm:$0xff] }
 0x7dc   :  { %3915 = vmatprep.mubr.msk.f32.mxu0 %vm4155_vm0, %v4154_v0 }
 0x89b   :  { %v1402_v11 = vpop.f32.mrf.mxu0 }
 0x89c   :  { %3904 = vmatpush3.msk.msra.mxu1 %vm156_vm1, %v1402_v11  ;;  %v2258_v11 = vld [vmem:[%s3615_s14] sm:$0xff] }
 0x89d   :  { %v3902_v12 = vpop.f32.mrf.mxu0  ;;  %3906 = vmatmul.mubr.msk.f32.vlgmr.msra.gmra.mxu1 %vm152_vm2, %v4331_v40  ;;  %3908 = vmatprep.subr.mxu1 %v4154_v0 }
 0x89e   :  { %3909 = vmatpush3.msra.mxu1 %v4290_v60  ;;  %3910 = vmatprep.mubr.msk.f32.mxu1 %vm4155_vm0, %v4154_v0  ;;  %v3679_v12 = vld [vmem:[%s3614_s18] ss:$0 sm:$0xff]  ;;  %s3630_s18 = sld [smem:[%s4621_s0 + %s4191_s15]]  }
 0x89f   :  { %3918 = vmatprep.subr.mxu1 %v4154_v0 }
 0x8a1   :  { %3911 = vmatmul.mubr.msk.f32.vlgmr.msra.gmra.mxu1 %vm478_vm3, %v4247_v26 }
 0x8a2   :  { %3919 = vmatpush3.msra.mxu1 %v4323_v38  ;;  %3926 = vmatprep.mubr.msk.f32.mxu1 %vm4155_vm0, %v4154_v0 }
 0x8a3   :  { %3920 = vmatprep.subr.mxu1 %v4154_v0 }
 0x8a4   :  { %3921 = vmatpush3.msra.mxu1 %v4325_v39 }
 0x8a5   :  { %3922 = vmatprep.subr.mxu1 %v4154_v0 }
 0x8a6   :  { %3923 = vmatpush3.msra.mxu1 %v4337_v44 }
 0x8a7   :  { %3924 = vmatprep.subr.mxu1 %v4154_v0 }
 0x8a8   :  { %3925 = vmatpush3.msra.mxu1 %v4341_v45 }
 0x8a9   :  { %3945 = vmatprep.subr.mxu1 %v4154_v0 }
 0x95d   :  { %v1482_v26 = vpop.f32.mrf.mxu1 }
 0x95f   :  { %v3907_v60 = vpop.f32.mrf.mxu1 }
 0x961   :  { %v1565_v13 = vpop.f32.mrf.mxu1 }
 0x962   :  { %3914 = vmatpush3.msk.msra.mxu0 %vm156_vm1, %v1565_v13 }
 0x963   :  { %v3912_v14 = vpop.f32.mrf.mxu1  ;;  %3916 = vmatmul.mubr.msk.f32.vlgmr.msra.gmra.mxu0 %vm152_vm2, %v4331_v40  ;;  %3929 = vmatprep.subr.mxu0 %v4154_v0 }
 0x964   :  { %3931 = vmatprep.mubr.msk.f32.mxu0 %vm4155_vm0, %v4154_v0 }
 0xa23   :  { %v1638_v15 = vpop.f32.mrf.mxu0 }
 0xa24   :  { %v1639_v16 = vadd.f32 %v4349_v48, %v1638_v15  ;;  %v2415_v15 = vld [vmem:[%s3617_s22 + $0x18] sm:$0xff] }
 0xa25   :  { %v3917_v17 = vpop.f32.mrf.mxu0 }
 0xa26   :  { %3927 = vmatmul.mubr.msk.f32.vlgmr.msra.gmra.mxu1 %vm1175_vm7, %v1639_v16  ;;  %v2414_v17 = vld [vmem:[%s3617_s22 + $0x10] sm:$0xff] }
 0xa27   :  { %3947 = vmatprep.mubr.msk.f32.mxu1 %vm4155_vm0, %v4154_v0 }
 0xae6   :  { %v1711_v18 = vpop.f32.mrf.mxu1 }
 0xae7   :  { %3930 = vmatpush3.msk.msra.mxu0 %vm156_vm1, %v1711_v18  ;;  %v2413_v18 = vld [vmem:[%s3617_s22 + $0x8] sm:$0xff] }
 0xae8   :  { %v3928_v19 = vpop.f32.mrf.mxu1  ;;  %3932 = vmatmul.mubr.msk.f32.vlgmr.msra.gmra.mxu0 %vm152_vm2, %v4331_v40  ;;  %3934 = vmatprep.subr.mxu0 %v4154_v0 }
 0xae9   :  { %3935 = vmatpush3.msra.mxu0 %v1332_v1  ;;  %3942 = vmatprep.mubr.msk.f32.mxu0 %vm4155_vm0, %v4154_v0  ;;  %v1950_v1 = vadd.f32 %v1949_v63, %v1948_v61  ;;  %v2412_v19 = vld [vmem:[%s3617_s22] sm:$0xff]  ;;  %s3628_s22 = sld [smem:[%s4621_s0 + %s4192_s19]]  }
 0xaea   :  { %3936 = vmatprep.subr.mxu0 %v4154_v0 }
 0xaeb   :  { %3937 = vmatpush3.msra.mxu0 %v1331_v4  ;;  %vm2056_vm11 = vcmp.gt.f32.partialorder %v1950_v1, 0.0 }
 0xaec   :  { %3938 = vmatprep.subr.mxu0 %v4154_v0 }
 0xaed   :  { %3939 = vmatpush3.msra.mxu0 %v1330_v5 }
 0xaee   :  { %3940 = vmatprep.subr.mxu0 %v4154_v0 }
 0xaef   :  { %3941 = vmatpush3.msra.mxu0 %v1329_v6 }
 0xaf0   :  { %3955 = vmatprep.subr.mxu0 %v4154_v0 }
 0xba8   :  { %v1784_v20 = vpop.f32.mrf.mxu0 }
 0xba9   :  { %v1785_v21 = vadd.f32 %v3660_v7, %v1784_v20  ;;  %v3682_v20 = vld [vmem:[%s3616_s26] ss:$0 sm:$0xff]  ;;  %s3631_s26 = sld [smem:[%s4621_s0 + %s4193_s23]]  }
 0xbaa   :  { %v3933_v22 = vpop.f32.mrf.mxu0 }
 0xbab   :  { %3943 = vmatmul.mubr.msk.f32.vlgmr.msra.gmra.mxu0 %vm1175_vm7, %v1785_v21 }
 0xbac   :  { %3957 = vmatprep.mubr.msk.f32.mxu0 %vm4155_vm0, %v4154_v0  ;;  %3956 = vmatpush3.msk.msra.mxu0 %vm156_vm1, %v4439_v27 }
 0xbad   :  { %3965 = vmatprep.subr.mxu0 %v4154_v0 }
 0xbaf   :  { %3958 = vmatmul.mubr.msk.f32.vlgmr.msra.gmra.mxu0 %vm152_vm2, %v4275_v51 }
 0xbb0   :  { %3973 = vmatprep.mubr.msk.f32.mxu0 %vm4155_vm0, %v4154_v0  ;;  %3966 = vmatpush3.msra.mxu0 %v2261_v8 }
 0xbb1   :  { %3967 = vmatprep.subr.mxu0 %v4154_v0 }
 0xbb2   :  { %3968 = vmatpush3.msra.mxu0 %v2260_v9 }
 0xbb3   :  { %3969 = vmatprep.subr.mxu0 %v4154_v0 }
 0xc6b   :  { %v1857_v23 = vpop.f32.mrf.mxu0 }
 0xc6c   :  { %3946 = vmatpush3.msk.msra.mxu1 %vm156_vm1, %v1857_v23 }
 0xc6d   :  { %v3944_v24 = vpop.f32.mrf.mxu0  ;;  %3948 = vmatmul.mubr.msk.f32.vlgmr.msra.gmra.mxu1 %vm152_vm2, %v4331_v40  ;;  %3950 = vmatprep.subr.mxu1 %v4154_v0 }
 0xc6e   :  { %3951 = vmatpush3.msra.mxu1 %v4167_v3  ;;  %3952 = vmatprep.mubr.msk.f32.mxu1 %vm4155_vm0, %v4154_v0  ;;  %v3664_v3 = vld [vmem:[%s3612_s10] ss:$0 sm:$0xff]  ;;  %s3626_s10 = sld [smem:[%s4621_s0 + %s4189_s7]]  }
 0xc6f   :  { %3960 = vmatprep.subr.mxu1 %v4154_v0  ;;  %v1483_v28 = vadd.f32 %v3664_v3, %v1482_v26  ;;  %v2142_v54 = vpop.f32.mrf.mxu0 }
 0xc71   :  { %3953 = vmatmul.mubr.msk.f32.vlgmr.msra.gmra.mxu1 %vm478_vm3, %v1967_v25  ;;  %v1487_v29 = vsel %vm1486_vm8, %v1483_v28, 0.0  ;;  %v3959_v55 = vpop.f32.mrf.mxu0 }
 0xc72   :  { %3962 = vmatprep.mubr.msk.f32.mxu1 %vm4155_vm0, %v4154_v0  ;;  %v1488_v30 = vrot.slane %v1487_v29, 4  ;;  %3961 = vmatpush3.msra.mxu1 %v2142_v54 }
 0xc73   :  { %3976 = vmatprep.subr.mxu1 %v4154_v0 }
 0xc74   :  { %v1489_v31 = vadd.f32 %v1488_v30, %v1487_v29 }
 0xc76   :  { %v1490_v32 = vrot.slane %v1489_v31, 2 }
 0xc78   :  { %v1491_v36 = vadd.f32 %v1490_v32, %v1489_v31 }
 0xc7a   :  { %v1492_v41 = vrot.slane %v1491_v36, 1 }
 0xc7c   :  { %v1493_v44 = vadd.f32 %v1492_v41, %v1491_v36 }
 0xc7e   :  { %v1495_v47 = vmul.f32 0.25, %v1493_v44  ;;  %v3020_v44 = vld [vmem:[%s3620_s4 + $0x18] sm:$0xff] }
 0xd2d   :  { %v1930_v33 = vpop.f32.mrf.mxu1 }
 0xd2e   :  { %v1931_v34 = vadd.f32 %v3664_v3, %v1930_v33 }
 0xd2f   :  { %v3949_v51 = vpop.f32.mrf.mxu1 }
 0xd30   :  { %v1934_v35 = vsel %vm1486_vm8, %v1931_v34, 0.0 }
 0xd31   :  { %v1935_v37 = vrot.slane %v1934_v35, 4  ;;  %v2052_v38 = vpop.f32.mrf.mxu1 }
 0xd32   :  { %4150 = vrsqrt.f32 %v2052_v38  ;;  %vm2059_vm10 = vcmp.gt.f32.partialorder %v2052_v38, 0.0  ;;  %v3014_v38 = vld [vmem:[%s3619_s30 + $0x8] sm:$0xff] }
 0xd33   :  { %v1936_v39 = vadd.f32 %v1935_v37, %v1934_v35  ;;  %v3954_v40 = vpop.f32.mrf.mxu1  ;;  %4152 = vrsqrt.f32 %v1950_v1  ;;  %v3016_v35 = vld [vmem:[%s3619_s30 + $0x18] sm:$0xff]  ;;  %v3015_v37 = vld [vmem:[%s3619_s30 + $0x10] sm:$0xff] }
 0xd35   :  { %v1937_v42 = vrot.slane %v1936_v39, 2 }
 0xd37   :  { %v1938_v43 = vadd.f32 %v1937_v42, %v1936_v39  ;;  %v3013_v39 = vld [vmem:[%s3619_s30] sm:$0xff] }
 0xd39   :  { %v1939_v45 = vrot.slane %v1938_v43, 1 }
 0xd3b   :  { %v1940_v46 = vadd.f32 %v1939_v45, %v1938_v43  ;;  %v3019_v45 = vld [vmem:[%s3620_s4 + $0x10] sm:$0xff] }
 0xd3d   :  { %v1941_v48 = vmul.f32 0.25, %v1940_v46  ;;  %v3018_v46 = vld [vmem:[%s3620_s4 + $0x8] sm:$0xff] }
 0xd3f   :  { %v4151_v49 = vpop.eup %4150  ;;  %v4452_v50 = vsel %vm1942_vm9, %v1495_v47, %v1941_v48  ;;  %v3017_v47 = vld [vmem:[%s3620_s4] sm:$0xff] }
 0xd40   :  { %v2061_v53 = vsel %vm2059_vm10, %v4151_v49, 0.0  ;;  %v4153_v2 = vpop.eup %4152  ;;  %v3685_v48 = vld [vmem:[%s3618_s8] ss:$0 sm:$0xff] }
 0xd41   :  { %2064 = vperm.xlu1 %4128, %v2061_v53   ;;  %v2058_v6 = vsel %vm2056_vm11, %v4153_v2, 0.0 }
 0xdbc   :  { %v2065_v4 = vpop.permute.xlu1 %2064 }
 0xdbd   :  { %v2067_v5 = vmul.f32 %v2065_v4, %v4358_v62  ;;  %v2259_v62 = vld [vmem:[%s3615_s14 + $0x8] sm:$0xff]  ;;  %s3629_s14 = sld [smem:[%s4621_s0 + %s4190_s11]]  }
 0xdbe   :  { %3970 = vmatpush3.msra.mxu0 %v2259_v62 }
 0xdbf   :  { %v2068_v7 = vmul.f32 %v2067_v5, %v2058_v6  ;;  %3971 = vmatprep.subr.mxu0 %v4154_v0 }
 0xdc0   :  { %3972 = vmatpush3.msra.mxu0 %v2258_v11 }
 0xdc1   :  { %2153 = vxpose.xlu1.b32.start.end [1/1] (short) (narrow) %v2068_v7, 8  ;;  %3992 = vmatprep.subr.mxu0 %v4154_v0 }
 0xe3d   :  { %v4463_v10 = vpop.trf.xlu1 }
 0xe3e   :  { %3963 = vmatmul.mubr.msk.f32.vlgmr.msra.gmra.mxu1 %vm478_vm3, %v4463_v10 }
 0xe3f   :  { %3978 = vmatprep.mubr.msk.f32.mxu1 %vm4155_vm0, %v4154_v0 }
 0xefe   :  { %v2254_v26 = vpop.f32.mrf.mxu1 }
 0xeff   :  { %v2255_v60 = vadd.f32 %v3679_v12, %v2254_v26  ;;  %v3257_v26 = vld [vmem:[%s3624_s20] sm:$0xf] }
 0xf00   :  { %v3964_v13 = vpop.f32.mrf.mxu1 }
 0xf01   :  { %3974 = vmatmul.mubr.msk.f32.vlgmr.msra.gmra.mxu0 %vm1175_vm7, %v2255_v60  ;;  %v3258_v60 = vld [vmem:[%s3625_s24] sm:$0xf] }
 0xf02   :  { %3994 = vmatprep.mubr.msk.f32.mxu0 %vm4155_vm0, %v4154_v0 }
 0xfc1   :  { %v2331_v14 = vpop.f32.mrf.mxu0 }
 0xfc2   :  { %3977 = vmatpush3.msra.mxu1 %v2331_v14  ;;  %v3696_v14 = vld [vmem:[%s3621_s28] ss:$0 sm:$0xff] }
 0xfc3   :  { %v3975_v16 = vpop.f32.mrf.mxu0  ;;  %3979 = vmatmul.mubr.msk.f32.vlgmr.msra.gmra.mxu1 %vm478_vm3, %v4463_v10  ;;  %3981 = vmatprep.subr.mxu1 %v4154_v0 }
 0xfc4   :  { %3982 = vmatpush3.msra.mxu1 %v2415_v15  ;;  %3989 = vmatprep.mubr.msk.f32.mxu1 %vm4155_vm0, %v4154_v0 }
 0xfc5   :  { %3983 = vmatprep.subr.mxu1 %v4154_v0 }
 0xfc6   :  { %3984 = vmatpush3.msra.mxu1 %v2414_v17 }
 0xfc7   :  { %3985 = vmatprep.subr.mxu1 %v4154_v0 }
 0xfc8   :  { %3986 = vmatpush3.msra.mxu1 %v2413_v18 }
 0xfc9   :  { %3987 = vmatprep.subr.mxu1 %v4154_v0 }
 0xfca   :  { %3988 = vmatpush3.msra.mxu1 %v2412_v19 }
 0xfcb   :  { %4002 = vmatprep.subr.mxu1 %v4154_v0 }
0x1083   :  { %v2408_v21 = vpop.f32.mrf.mxu1 }
0x1084   :  { %v2409_v22 = vadd.f32 %v3682_v20, %v2408_v21 }
0x1085   :  { %v3980_v23 = vpop.f32.mrf.mxu1 }
0x1086   :  { %3990 = vmatmul.mubr.msk.f32.vlgmr.msra.gmra.mxu1 %vm1175_vm7, %v2409_v22  ;;  %v3420_v22 = vld [vmem:[%s3627_s6 + $0x8] sm:$0xff]  ;;  %v3419_v23 = vld [vmem:[%s3627_s6] sm:$0xff] }
0x1087   :  { %4004 = vmatprep.mubr.msk.f32.mxu1 %vm4155_vm0, %v4154_v0 }
0x1146   :  { %v2485_v24 = vpop.f32.mrf.mxu1 }
0x1147   :  { %3993 = vmatpush3.msra.mxu0 %v2485_v24 }
0x1148   :  { %v3991_v25 = vpop.f32.mrf.mxu1  ;;  %3995 = vmatmul.mubr.msk.f32.vlgmr.msra.gmra.mxu0 %vm478_vm3, %v4463_v10  ;;  %3997 = vmatprep.subr.mxu0 %v4154_v0 }
0x1149   :  { %3998 = vmatpush3.msk.msra.mxu0 %vm156_vm1, %v4439_v27  ;;  %3999 = vmatprep.mubr.msk.f32.mxu0 %vm4155_vm0, %v4154_v0 }
0x114a   :  { %4007 = vmatprep.subr.mxu0 %v4154_v0 }
0x114c   :  { %4000 = vmatmul.mubr.msk.f32.vlgmr.msra.gmra.mxu0 %vm152_vm2, %v4277_v52 }
0x114d   :  { %4008 = vmatpush3.msra.mxu0 %v2261_v8  ;;  %4015 = vmatprep.mubr.msk.f32.mxu0 %vm4155_vm0, %v4154_v0 }
0x114e   :  { %4009 = vmatprep.subr.mxu0 %v4154_v0 }
0x114f   :  { %4010 = vmatpush3.msra.mxu0 %v2260_v9 }
0x1150   :  { %4011 = vmatprep.subr.mxu0 %v4154_v0 }
0x1151   :  { %4012 = vmatpush3.msra.mxu0 %v2259_v62  ;;  %v3176_v62 = vld [vmem:[%s3622_s12] sm:$0xff] }
0x1152   :  { %4013 = vmatprep.subr.mxu0 %v4154_v0 }
0x1153   :  { %4014 = vmatpush3.msra.mxu0 %v2258_v11 }
0x1154   :  { %4034 = vmatprep.subr.mxu0 %v4154_v0 }
0x1208   :  { %v4511_v27 = vpop.f32.mrf.mxu0 }
0x1209   :  { %v2563_v49 = vadd.f32 %v3685_v48, %v4511_v27  ;;  %v3703_v27 = vld [vmem:[%s3626_s10] ss:$0 sm:$0xff] }
0x120a   :  { %v3996_v3 = vpop.f32.mrf.mxu0 }
0x120c   :  { %v2644_v28 = vpop.f32.mrf.mxu0 }
0x120d   :  { %4003 = vmatpush3.msra.mxu1 %v2644_v28 }
0x120e   :  { %v4001_v52 = vpop.f32.mrf.mxu0  ;;  %4005 = vmatmul.mubr.msk.f32.vlgmr.msra.gmra.mxu1 %vm478_vm3, %v4463_v10  ;;  %4018 = vmatprep.subr.mxu1 %v4154_v0 }
0x120f   :  { %4020 = vmatprep.mubr.msk.f32.mxu1 %vm4155_vm0, %v4154_v0 }
0x12ce   :  { %v2714_v29 = vpop.f32.mrf.mxu1 }
0x12cf   :  { %v2715_v30 = vadd.f32 %v3679_v12, %v2714_v29  ;;  %v3175_v12 = vld [vmem:[%s3600_s16] sm:$0x3] }
0x12d0   :  { %v4006_v31 = vpop.f32.mrf.mxu1 }
0x12d1   :  { %4016 = vmatmul.mubr.msk.f32.vlgmr.msra.gmra.mxu0 %vm1175_vm7, %v2715_v30  ;;  %v77_v30 = vstv %s3630_s18  ;;  %v3704_v31 = vld [vmem:[%s3628_s22] ss:$0 sm:$0xff] }
0x12d2   :  { %4036 = vmatprep.mubr.msk.f32.mxu0 %vm4155_vm0, %v4154_v0  ;;  %78 = vst [vmem:[#allocation2] sm:$0x1] %v77_v30 }
0x1391   :  { %v2787_v32 = vpop.f32.mrf.mxu0 }
0x1392   :  { %4019 = vmatpush3.msra.mxu1 %v2787_v32 }
0x1393   :  { %v4017_v33 = vpop.f32.mrf.mxu0  ;;  %4021 = vmatmul.mubr.msk.f32.vlgmr.msra.gmra.mxu1 %vm478_vm3, %v4463_v10  ;;  %4023 = vmatprep.subr.mxu1 %v4154_v0 }
0x1394   :  { %4024 = vmatpush3.msra.mxu1 %v2415_v15  ;;  %4031 = vmatprep.mubr.msk.f32.mxu1 %vm4155_vm0, %v4154_v0 }
0x1395   :  { %4025 = vmatprep.subr.mxu1 %v4154_v0 }
0x1396   :  { %4026 = vmatpush3.msra.mxu1 %v2414_v17  ;;  %v3697_v17 = vld [vmem:[%s3623_s2] ss:$0 sm:$0xff] }
0x1397   :  { %4027 = vmatprep.subr.mxu1 %v4154_v0 }
0x1398   :  { %4028 = vmatpush3.msra.mxu1 %v2413_v18 }
0x1399   :  { %4029 = vmatprep.subr.mxu1 %v4154_v0 }
0x139a   :  { %4030 = vmatpush3.msra.mxu1 %v2412_v19 }
0x139b   :  { %4050 = vmatprep.subr.mxu1 %v4154_v0 }
0x1453   :  { %v2857_v34 = vpop.f32.mrf.mxu1 }
0x1454   :  { %v2858_v51 = vadd.f32 %v3682_v20, %v2857_v34 }
0x1455   :  { %v4022_v36 = vpop.f32.mrf.mxu1 }
0x1456   :  { %4032 = vmatmul.mubr.msk.f32.vlgmr.msra.gmra.mxu1 %vm1175_vm7, %v2858_v51  ;;  %v3706_v51 = vld [vmem:[#allocation2] ss:$0 sm:$0xff] }
0x1457   :  { %4051 = vmatpush3.msra.mxu1 %v3016_v35  ;;  %4058 = vmatprep.mubr.msk.f32.mxu1 %vm4155_vm0, %v4154_v0 }
0x1458   :  { %4052 = vmatprep.subr.mxu1 %v4154_v0 }
0x1459   :  { %4053 = vmatpush3.msra.mxu1 %v3015_v37 }
0x145a   :  { %4054 = vmatprep.subr.mxu1 %v4154_v0 }
0x145b   :  { %4055 = vmatpush3.msra.mxu1 %v3014_v38 }
0x145c   :  { %4056 = vmatprep.subr.mxu1 %v4154_v0 }
0x145d   :  { %4057 = vmatpush3.msra.mxu1 %v3013_v39 }
0x145e   :  { %4059 = vmatmul.mubr.msk.f32.vlgmr.msra.gmra.mxu1 %vm1175_vm7, %v4452_v50  ;;  %4066 = vmatprep.subr.mxu1 %v4154_v0  ;;  %v2566_v50 = vsel %vm1175_vm7, %v2563_v49, 0.0 }
0x145f   :  { %4068 = vmatprep.mubr.msk.f32.mxu1 %vm4155_vm0, %v4154_v0  ;;  %v2567_v53 = vrot.slane %v2566_v50, 4  ;;  %4067 = vmatpush3.msk.msra.mxu1 %vm156_vm1, %v3258_v60 }
0x1460   :  { %4076 = vmatprep.subr.mxu1 %v4154_v0 }
0x1461   :  { %v2568_v54 = vadd.f32 %v2567_v53, %v2566_v50 }
0x1463   :  { %v2569_v55 = vrot.slane %v2568_v54, 2 }
0x1465   :  { %v2570_v61 = vadd.f32 %v2569_v55, %v2568_v54 }
0x1467   :  { %v2571_v2 = vrot.slane %v2570_v61, 1 }
0x1469   :  { %v2572_v6 = vadd.f32 %v2571_v2, %v2570_v61 }
0x146b   :  { %v2574_v9 = vmul.f32 0.125, %v2572_v6 }
0x1516   :  { %v2930_v40 = vpop.f32.mrf.mxu1 }
0x1517   :  { %4035 = vmatpush3.msra.mxu0 %v2930_v40 }
0x1518   :  { %v4033_v41 = vpop.f32.mrf.mxu1  ;;  %4037 = vmatmul.mubr.msk.f32.vlgmr.msra.gmra.mxu0 %vm478_vm3, %v4463_v10  ;;  %4039 = vmatprep.subr.mxu0 %v4154_v0 }
0x1519   :  { %4047 = vmatprep.mubr.msk.f32.mxu0 %vm4155_vm0, %v4154_v0  ;;  %4040 = vmatpush3.msra.mxu0 %v3020_v44 }
0x151a   :  { %4041 = vmatprep.subr.mxu0 %v4154_v0 }
0x151b   :  { %4042 = vmatpush3.msra.mxu0 %v3019_v45 }
0x151c   :  { %4043 = vmatprep.subr.mxu0 %v4154_v0 }
0x151d   :  { %4044 = vmatpush3.msra.mxu0 %v3018_v46 }
0x151e   :  { %v4549_v42 = vpop.f32.mrf.mxu1  ;;  %4045 = vmatprep.subr.mxu0 %v4154_v0 }
0x151f   :  { %4046 = vmatpush3.msra.mxu0 %v3017_v47 }
0x1520   :  { %v4060_v43 = vpop.f32.mrf.mxu1  ;;  %4061 = vmatprep.subr.mxu0 %v4154_v0 }
0x15d8   :  { %v3000_v56 = vpop.f32.mrf.mxu0 }
0x15d9   :  { %v3001_v57 = vadd.f32 %v3685_v48, %v3000_v56 }
0x15da   :  { %v4038_v58 = vpop.f32.mrf.mxu0 }
0x15db   :  { %v3004_v59 = vsel %vm1175_vm7, %v3001_v57, 0.0 }
0x15dc   :  { %v3005_v63 = vrot.slane %v3004_v59, 4 }
0x15de   :  { %v3006_v1 = vadd.f32 %v3005_v63, %v3004_v59 }
0x15e0   :  { %v3007_v4 = vrot.slane %v3006_v1, 2 }
0x15e2   :  { %v3008_v5 = vadd.f32 %v3007_v4, %v3006_v1 }
0x15e4   :  { %v3009_v7 = vrot.slane %v3008_v5, 1 }
0x15e6   :  { %v3010_v8 = vadd.f32 %v3009_v7, %v3008_v5 }
0x15e8   :  { %v3011_v10 = vmul.f32 0.125, %v3010_v8 }
0x15ea   :  { %v3012_v11 = vsel %vm1942_vm9, %v2574_v9, %v3011_v10 }
0x15eb   :  { %4048 = vmatmul.mubr.msk.f32.vlgmr.msra.gmra.mxu0 %vm1175_vm7, %v3012_v11 }
0x15ec   :  { %4062 = vmatpush3.msra.mxu0 %v3176_v62  ;;  %4063 = vmatprep.mubr.msk.f32.mxu0 %vm4155_vm0, %v4154_v0 }
0x15ed   :  { %4071 = vmatprep.subr.mxu0 %v4154_v0 }
0x15ef   :  { %4064 = vmatmul.mubr.msk.f32.vlgmr.msra.gmra.mxu0 %vm478_vm3, %v3175_v12 }
0x15f0   :  { %4073 = vmatprep.mubr.msk.f32.mxu0 %vm4155_vm0, %v4154_v0  ;;  %4072 = vmatpush3.msk.msra.mxu0 %vm156_vm1, %v3257_v26 }
0x15f1   :  { %4083 = vmatprep.subr.mxu0 %v4154_v0 }
0x16ab   :  { %v3090_v13 = vpop.f32.mrf.mxu0 }
0x16ac   :  { %v3164_v15 = vadd.f32 %v4549_v42, %v3090_v13 }
0x16ad   :  { %v4049_v16 = vpop.f32.mrf.mxu0 }
0x16ae   :  { %v3174_v18 = vadd.f32 %v3696_v14, %v3164_v15 }
0x16af   :  { %v3253_v19 = vpop.f32.mrf.mxu0 }
0x16b0   :  { %v3254_v20 = vadd.f32 %v3697_v17, %v3253_v19  ;;  %4074 = vmatmul.mubr.msk.f32.vlgmr.msra.gmra.mxu0 %vm152_vm2, %v3174_v18 }
0x16b1   :  { %v4065_v21 = vpop.f32.mrf.mxu0  ;;  %4085 = vmatprep.mubr.msk.f32.mxu0 %vm4155_vm0, %v4154_v0 }
0x16b2   :  { %4069 = vmatmul.mubr.msk.f32.vlgmr.msra.gmra.mxu1 %vm152_vm2, %v3254_v20 }
0x16b3   :  { %4080 = vmatprep.mubr.msk.f32.mxu1 %vm4155_vm0, %v4154_v0  ;;  %4077 = vmatpush3.msra.mxu1 %v3420_v22 }
0x16b4   :  { %4078 = vmatprep.subr.mxu1 %v4154_v0  ;;  %v3502_v0 = vld [vmem:[%s3629_s14] sm:$0xff] }
0x16b5   :  { %4079 = vmatpush3.msra.mxu1 %v3419_v23  ;;  %4084 = vmatpush3.msra.mxu0 %v3502_v0 }
0x1770   :  { %v3407_v24 = vpop.f32.mrf.mxu0 }
0x1772   :  { %v3331_v25 = vpop.f32.mrf.mxu1  ;;  %v4075_v3 = vpop.f32.mrf.mxu0 }
0x1773   :  { %v3408_v28 = vadd.f32 %v3407_v24, %v3331_v25 }
0x1774   :  { %v4070_v52 = vpop.f32.mrf.mxu1 }
0x1775   :  { %v3418_v29 = vadd.f32 %v3703_v27, %v3408_v28 }
0x1777   :  { %4081 = vmatmul.mubr.msk.f32.vlgmr.msra.gmra.mxu1 %vm3428_vm12, %v3418_v29 }
0x1837   :  { %v3498_v32 = vpop.f32.mrf.mxu1 }
0x1838   :  { %v3499_v33 = vadd.f32 %v3704_v31, %v3498_v32 }
0x1839   :  { %v4082_v34 = vpop.f32.mrf.mxu1 }
0x183a   :  { %4086 = vmatmul.mubr.msk.f32.vlgmr.msra.gmra.mxu0 %vm478_vm3, %v3499_v33 }
0x18fa   :  { %v3579_v35 = vpop.f32.mrf.mxu0 }
0x18fb   :  { %v3580_v36 = vadd.f32 %v3706_v51, %v3579_v35 }
0x18fc   :  { %v4087_v37 = vpop.f32.mrf.mxu0 }
0x18fd   :  { %3584 = vst.msk [vmem:[%s3631_s26] sm:$0x3] %vm3583_vm13, %v3580_v36 }

</bundles_post_ra>
